<compile_context>
chip_gen: v5e
topology: v5e:2x2
jax: 0.10.0
libtpu: 0.0.40
codegen_flags: <defaults>
</compile_context>

<pallas_src>
import jax
import jax.numpy as jnp
from jax.experimental import pallas as pl
from jax.experimental.pallas import tpu as pltpu


# ----------------------------------------------------------------------------
# Fused TAFE kernel: one grid step per batch element.
#   seg[b]  = (W_stem @ W_out)ᵀ @ x[b] + (b_stem @ W_out + b_out)ᵀ   (lane-dense)
#   cls[b]  = MLP( W_deepᵀ @ (W_stemᵀ @ GAP(x[b]) + b_stemᵀ) + b_deepᵀ )
# All weights are passed pre-transposed ("column" orientation) so every matmul
# keeps the long/voxel axis (or the hidden axis) on lanes.
# ----------------------------------------------------------------------------
def _tafe_fused_kernel(
    x_ref,                                   # (1, Cin, N)
    wseg_ref, bseg_ref,                      # (Cout, Cin), (Cout, 1)
    wstem_ref, bstem_ref,                    # (F, Cin),    (F, 1)
    wdeep_ref, bdeep_ref,                    # (Cd, F),     (Cd, 1)
    w1_ref, b1_ref,                          # (H1, Cd),    (H1, 1)
    w2_ref, b2_ref,                          # (H2, H1),    (H2, 1)
    w3_ref, b3_ref,                          # (K, H2),     (K, 1)
    seg_ref,                                 # (1, Cout, N)
    cls_ref,                                 # (1, K, 1)
):
    x = x_ref[0]                             # (Cin, N), channels in sublanes

    # --- segmentation head: fused stem+out 1x1x1 conv, lane-dense output ----
    seg = (
        jnp.dot(wseg_ref[...], x, preferred_element_type=jnp.float32)
        + bseg_ref[...]
    )                                        # (Cout, N)
    seg_ref[0] = seg.astype(seg_ref.dtype)

    # --- classification path: GAP over voxels, then linear chain + MLP ------
    inv_n = 1.0 / x.shape[-1]
    gap = jnp.sum(x, axis=-1, keepdims=True) * inv_n                    # (Cin, 1)
    feat = (
        jnp.dot(wstem_ref[...], gap, preferred_element_type=jnp.float32)
        + bstem_ref[...]
    )                                                                   # (F, 1)
    deep = (
        jnp.dot(wdeep_ref[...], feat, preferred_element_type=jnp.float32)
        + bdeep_ref[...]
    )                                                                   # (Cd, 1)
    h = jnp.maximum(
        jnp.dot(w1_ref[...], deep, preferred_element_type=jnp.float32) + b1_ref[...],
        0.0,
    )                                                                   # (H1, 1)
    h = jnp.maximum(
        jnp.dot(w2_ref[...], h, preferred_element_type=jnp.float32) + b2_ref[...],
        0.0,
    )                                                                   # (H2, 1)
    cls = (
        jnp.dot(w3_ref[...], h, preferred_element_type=jnp.float32) + b3_ref[...]
    )                                                                   # (K, 1)
    cls_ref[0] = cls.astype(cls_ref.dtype)


# ----------------------------------------------------------------------------
# TAFE forward (stand-in backbone + single fused Pallas kernel)
# ----------------------------------------------------------------------------
def tafe_forward(x_in, params, *, feature_size, down):
    """
    x_in: [B, C_in, D, H, W] (NCDHW, float32)
    returns (seg_logits [B, out_channels, D, H, W], cls_logits [B, num_classes])
    """
    B, Cin, D, H, W = x_in.shape
    # The pooled->deep-conv->GAP algebraic collapse is exact only when the
    # spatial dims divide the stand-in pooling factor (same assumption the
    # previous reshape-based pooling made).
    assert D % down == 0 and H % down == 0 and W % down == 0

    N = D * H * W
    x = x_in.reshape(B, Cin, N)              # channels-first; pure reshape, no transpose

    Fsz = feature_size
    Cout = params["w_out"].shape[1]
    C_deep = params["w_deep"].shape[1]       # feature_size * 16
    H1 = params["w1"].shape[1]
    H2 = params["w2"].shape[1]
    K = params["w3"].shape[1]

    # Fuse stem 1x1x1 conv with seg-output 1x1x1 conv (exact: both pointwise linear).
    w_seg = params["w_stem"] @ params["w_out"]                      # (Cin, Cout)
    b_seg = params["b_stem"] @ params["w_out"] + params["b_out"]    # (1, Cout)

    # Pre-transpose tiny weights to "column" orientation used inside the kernel.
    wseg_t = w_seg.T                         # (Cout, Cin)
    bseg_c = b_seg.T                         # (Cout, 1)
    wstem_t = params["w_stem"].T             # (F, Cin)
    bstem_c = params["b_stem"].T             # (F, 1)
    wdeep_t = params["w_deep"].T             # (Cd, F)
    bdeep_c = params["b_deep"].T             # (Cd, 1)
    w1_t, b1_c = params["w1"].T, params["b1"].T
    w2_t, b2_c = params["w2"].T, params["b2"].T
    w3_t, b3_c = params["w3"].T, params["b3"].T

    def full(shape):
        return pl.BlockSpec(shape, lambda b: (0,) * len(shape))

    seg, cls = pl.pallas_call(
        _tafe_fused_kernel,
        out_shape=(
            jax.ShapeDtypeStruct((B, Cout, N), jnp.float32),
            jax.ShapeDtypeStruct((B, K, 1), jnp.float32),
        ),
        grid_spec=pltpu.PrefetchScalarGridSpec(
            num_scalar_prefetch=0,
            grid=(B,),                                            # one step per batch
            in_specs=[
                pl.BlockSpec((1, Cin, N), lambda b: (b, 0, 0)),   # voxels on lanes
                full((Cout, Cin)), full((Cout, 1)),
                full((Fsz, Cin)), full((Fsz, 1)),
                full((C_deep, Fsz)), full((C_deep, 1)),
                full((H1, C_deep)), full((H1, 1)),
                full((H2, H1)), full((H2, 1)),
                full((K, H2)), full((K, 1)),
            ],
            out_specs=[
                pl.BlockSpec((1, Cout, N), lambda b: (b, 0, 0)),  # lane-dense seg
                pl.BlockSpec((1, K, 1), lambda b: (b, 0, 0)),
            ],
        ),
        compiler_params=pltpu.CompilerParams(
            dimension_semantics=("parallel",),   # both v7x TensorCores get a batch
        ),
    )(x, wseg_t, bseg_c, wstem_t, bstem_c, wdeep_t, bdeep_c,
      w1_t, b1_c, w2_t, b2_c, w3_t, b3_c)

    seg_logits = seg.reshape(B, Cout, D, H, W)   # contiguous reshape, no transpose
    cls_logits = cls.reshape(B, K)
    return seg_logits, cls_logits


def init_params(key, *, in_channels, feature_size, out_channels, num_classes):
    c_deep = feature_size * 16
    ks = jax.random.split(key, 12)
    n = lambda k, shp: (0.05 * jax.random.normal(k, shp)).astype(jnp.float32)
    return {
        "w_stem": n(ks[0], (in_channels, feature_size)),
        "b_stem": n(ks[1], (1, feature_size)),
        "w_deep": n(ks[2], (feature_size, c_deep)),
        "b_deep": n(ks[3], (1, c_deep)),
        "w_out":  n(ks[4], (feature_size, out_channels)),
        "b_out":  n(ks[5], (1, out_channels)),
        "w1": n(ks[6], (c_deep, 256)), "b1": n(ks[7], (1, 256)),
        "w2": n(ks[8], (256, 64)),     "b2": n(ks[9], (1, 64)),
        "w3": n(ks[10], (64, num_classes)), "b3": n(ks[11], (1, num_classes)),
    }


if __name__ == "__main__":
    # Small shapes consistent with the module's forward signature.
    B, C_IN, D, H, W = 2, 4, 16, 16, 16
    FEATURE_SIZE = 8          # -> classification_channels = feature_size * 16 = 128
    OUT_CHANNELS = 2          # seg_logits: [B, 2, D, H, W]
    NUM_CLASSES = 2
    DOWN = 8                  # stand-in deep-feature downsampling factor

    key = jax.random.PRNGKey(0)
    k_x, k_p = jax.random.split(key)
    x_in = jax.random.normal(k_x, (B, C_IN, D, H, W), dtype=jnp.float32)
    params = init_params(
        k_p,
        in_channels=C_IN,
        feature_size=FEATURE_SIZE,
        out_channels=OUT_CHANNELS,
        num_classes=NUM_CLASSES,
    )

    seg_logits, cls_logits = tafe_forward(
        x_in, params, feature_size=FEATURE_SIZE, down=DOWN
    )
    jax.block_until_ready((seg_logits, cls_logits))

    assert seg_logits.shape == (B, OUT_CHANNELS, D, H, W), seg_logits.shape
    assert cls_logits.shape == (B, NUM_CLASSES), cls_logits.shape
    print("KERNEL_OK")
</pallas_src>

<mosaic_0001>
module attributes {stable_mosaic.version = 11 : i64} {
  func.func @_tafe_fused_kernel(%arg0: i32, %arg1: memref<1x4x4096xf32, #tpu.memory_space<vmem>>, %arg2: memref<2x4xf32, #tpu.memory_space<vmem>>, %arg3: memref<2x1xf32, #tpu.memory_space<vmem>>, %arg4: memref<8x4xf32, #tpu.memory_space<vmem>>, %arg5: memref<8x1xf32, #tpu.memory_space<vmem>>, %arg6: memref<128x8xf32, #tpu.memory_space<vmem>>, %arg7: memref<128x1xf32, #tpu.memory_space<vmem>>, %arg8: memref<256x128xf32, #tpu.memory_space<vmem>>, %arg9: memref<256x1xf32, #tpu.memory_space<vmem>>, %arg10: memref<64x256xf32, #tpu.memory_space<vmem>>, %arg11: memref<64x1xf32, #tpu.memory_space<vmem>>, %arg12: memref<2x64xf32, #tpu.memory_space<vmem>>, %arg13: memref<2x1xf32, #tpu.memory_space<vmem>>, %arg14: memref<1x2x4096xf32, #tpu.memory_space<vmem>>, %arg15: memref<1x2x1xf32, #tpu.memory_space<vmem>>) attributes {dimension_semantics = [#tpu.dimension_semantics<parallel>], iteration_bounds = array<i64: 2>, scalar_prefetch = 0 : i64, scratch_operands = 0 : i64, tpu.core_type = #tpu.core_type<tc>, window_params = [{transform_indices = @transform_0, window_bounds = array<i64: 1, 4, 4096>}, {pipeline_mode = #tpu.pipeline_mode<synchronous>, transform_indices = @transform_1, window_bounds = array<i64: 2, 4>}, {pipeline_mode = #tpu.pipeline_mode<synchronous>, transform_indices = @transform_2, window_bounds = array<i64: 2, 1>}, {pipeline_mode = #tpu.pipeline_mode<synchronous>, transform_indices = @transform_3, window_bounds = array<i64: 8, 4>}, {pipeline_mode = #tpu.pipeline_mode<synchronous>, transform_indices = @transform_4, window_bounds = array<i64: 8, 1>}, {pipeline_mode = #tpu.pipeline_mode<synchronous>, transform_indices = @transform_5, window_bounds = array<i64: 128, 8>}, {pipeline_mode = #tpu.pipeline_mode<synchronous>, transform_indices = @transform_6, window_bounds = array<i64: 128, 1>}, {pipeline_mode = #tpu.pipeline_mode<synchronous>, transform_indices = @transform_7, window_bounds = array<i64: 256, 128>}, {pipeline_mode = #tpu.pipeline_mode<synchronous>, transform_indices = @transform_8, window_bounds = array<i64: 256, 1>}, {pipeline_mode = #tpu.pipeline_mode<synchronous>, transform_indices = @transform_9, window_bounds = array<i64: 64, 256>}, {pipeline_mode = #tpu.pipeline_mode<synchronous>, transform_indices = @transform_10, window_bounds = array<i64: 64, 1>}, {pipeline_mode = #tpu.pipeline_mode<synchronous>, transform_indices = @transform_11, window_bounds = array<i64: 2, 64>}, {pipeline_mode = #tpu.pipeline_mode<synchronous>, transform_indices = @transform_12, window_bounds = array<i64: 2, 1>}, {transform_indices = @transform_13, window_bounds = array<i64: 1, 2, 4096>}, {transform_indices = @transform_14, window_bounds = array<i64: 1, 2, 1>}]} {
    %c0 = arith.constant 0 : index
    %c0_0 = arith.constant 0 : index
    %c0_1 = arith.constant 0 : index
    %0 = vector.load %arg1[%c0, %c0_0, %c0_1] : memref<1x4x4096xf32, #tpu.memory_space<vmem>>, vector<1x4x4096xf32>
    %1 = vector.shape_cast %0 : vector<1x4x4096xf32> to vector<4x4096xf32>
    %c0_2 = arith.constant 0 : index
    %c0_3 = arith.constant 0 : index
    %2 = vector.load %arg2[%c0_2, %c0_3] : memref<2x4xf32, #tpu.memory_space<vmem>>, vector<2x4xf32>
    %cst = arith.constant dense<0.000000e+00> : vector<2x4096xf32>
    %3 = tpu.matmul %2, %1, %cst {dimension_numbers = #tpu.dot_dimension_numbers<[1], [0], [0], [1], [0, 0, 1, 1], [], []>} : vector<2x4xf32>, vector<4x4096xf32>, vector<2x4096xf32> -> vector<2x4096xf32>
    %c0_4 = arith.constant 0 : index
    %c0_5 = arith.constant 0 : index
    %4 = vector.load %arg3[%c0_4, %c0_5] : memref<2x1xf32, #tpu.memory_space<vmem>>, vector<2x1xf32>
    %5 = vector.broadcast %4 : vector<2x1xf32> to vector<2x4096xf32>
    %6 = arith.addf %3, %5 : vector<2x4096xf32>
    %c0_6 = arith.constant 0 : index
    %c0_7 = arith.constant 0 : index
    %c0_8 = arith.constant 0 : index
    %7 = vector.load %arg14[%c0_6, %c0_7, %c0_8] : memref<1x2x4096xf32, #tpu.memory_space<vmem>>, vector<1x2x4096xf32>
    %8 = vector.shape_cast %7 : vector<1x2x4096xf32> to vector<2x4096xf32>
    %9 = vector.shape_cast %6 : vector<2x4096xf32> to vector<1x2x4096xf32>
    tpu.vector_store %arg14[%c0_6, %c0_7, %c0_8], %9 {strides = array<i32>} : memref<1x2x4096xf32, #tpu.memory_space<vmem>>, vector<1x2x4096xf32>,
    %cst_9 = arith.constant dense<0.000000e+00> : vector<4xf32>
    %10 = vector.multi_reduction <add>, %1, %cst_9 [1] : vector<4x4096xf32> to vector<4xf32>
    %11 = vector.shape_cast %10 : vector<4xf32> to vector<4x1xf32>
    %cst_10 = arith.constant 2.44140625E-4 : f32
    %12 = vector.broadcast %cst_10 : f32 to vector<4x1xf32>
    %13 = arith.mulf %11, %12 : vector<4x1xf32>
    %c0_11 = arith.constant 0 : index
    %c0_12 = arith.constant 0 : index
    %14 = vector.load %arg4[%c0_11, %c0_12] : memref<8x4xf32, #tpu.memory_space<vmem>>, vector<8x4xf32>
    %cst_13 = arith.constant dense<0.000000e+00> : vector<8x1xf32>
    %15 = tpu.matmul %14, %13, %cst_13 {dimension_numbers = #tpu.dot_dimension_numbers<[1], [0], [0], [1], [0, 0, 1, 1], [], []>} : vector<8x4xf32>, vector<4x1xf32>, vector<8x1xf32> -> vector<8x1xf32>
    %c0_14 = arith.constant 0 : index
    %c0_15 = arith.constant 0 : index
    %16 = vector.load %arg5[%c0_14, %c0_15] : memref<8x1xf32, #tpu.memory_space<vmem>>, vector<8x1xf32>
    %17 = arith.addf %15, %16 : vector<8x1xf32>
    %c0_16 = arith.constant 0 : index
    %c0_17 = arith.constant 0 : index
    %18 = vector.load %arg6[%c0_16, %c0_17] : memref<128x8xf32, #tpu.memory_space<vmem>>, vector<128x8xf32>
    %cst_18 = arith.constant dense<0.000000e+00> : vector<128x1xf32>
    %19 = tpu.matmul %18, %17, %cst_18 {dimension_numbers = #tpu.dot_dimension_numbers<[1], [0], [0], [1], [0, 0, 1, 1], [], []>} : vector<128x8xf32>, vector<8x1xf32>, vector<128x1xf32> -> vector<128x1xf32>
    %c0_19 = arith.constant 0 : index
    %c0_20 = arith.constant 0 : index
    %20 = vector.load %arg7[%c0_19, %c0_20] : memref<128x1xf32, #tpu.memory_space<vmem>>, vector<128x1xf32>
    %21 = arith.addf %19, %20 : vector<128x1xf32>
    %c0_21 = arith.constant 0 : index
    %c0_22 = arith.constant 0 : index
    %22 = vector.load %arg8[%c0_21, %c0_22] : memref<256x128xf32, #tpu.memory_space<vmem>>, vector<256x128xf32>
    %cst_23 = arith.constant dense<0.000000e+00> : vector<256x1xf32>
    %23 = tpu.matmul %22, %21, %cst_23 {dimension_numbers = #tpu.dot_dimension_numbers<[1], [0], [0], [1], [0, 0, 1, 1], [], []>} : vector<256x128xf32>, vector<128x1xf32>, vector<256x1xf32> -> vector<256x1xf32>
    %c0_24 = arith.constant 0 : index
    %c0_25 = arith.constant 0 : index
    %24 = vector.load %arg9[%c0_24, %c0_25] : memref<256x1xf32, #tpu.memory_space<vmem>>, vector<256x1xf32>
    %25 = arith.addf %23, %24 : vector<256x1xf32>
    %cst_26 = arith.constant 0.000000e+00 : f32
    %26 = vector.broadcast %cst_26 : f32 to vector<256x1xf32>
    %27 = arith.maximumf %25, %26 : vector<256x1xf32>
    %c0_27 = arith.constant 0 : index
    %c0_28 = arith.constant 0 : index
    %28 = vector.load %arg10[%c0_27, %c0_28] : memref<64x256xf32, #tpu.memory_space<vmem>>, vector<64x256xf32>
    %cst_29 = arith.constant dense<0.000000e+00> : vector<64x1xf32>
    %29 = tpu.matmul %28, %27, %cst_29 {dimension_numbers = #tpu.dot_dimension_numbers<[1], [0], [0], [1], [0, 0, 1, 1], [], []>} : vector<64x256xf32>, vector<256x1xf32>, vector<64x1xf32> -> vector<64x1xf32>
    %c0_30 = arith.constant 0 : index
    %c0_31 = arith.constant 0 : index
    %30 = vector.load %arg11[%c0_30, %c0_31] : memref<64x1xf32, #tpu.memory_space<vmem>>, vector<64x1xf32>
    %31 = arith.addf %29, %30 : vector<64x1xf32>
    %cst_32 = arith.constant 0.000000e+00 : f32
    %32 = vector.broadcast %cst_32 : f32 to vector<64x1xf32>
    %33 = arith.maximumf %31, %32 : vector<64x1xf32>
    %c0_33 = arith.constant 0 : index
    %c0_34 = arith.constant 0 : index
    %34 = vector.load %arg12[%c0_33, %c0_34] : memref<2x64xf32, #tpu.memory_space<vmem>>, vector<2x64xf32>
    %cst_35 = arith.constant dense<0.000000e+00> : vector<2x1xf32>
    %35 = tpu.matmul %34, %33, %cst_35 {dimension_numbers = #tpu.dot_dimension_numbers<[1], [0], [0], [1], [0, 0, 1, 1], [], []>} : vector<2x64xf32>, vector<64x1xf32>, vector<2x1xf32> -> vector<2x1xf32>
    %c0_36 = arith.constant 0 : index
    %c0_37 = arith.constant 0 : index
    %36 = vector.load %arg13[%c0_36, %c0_37] : memref<2x1xf32, #tpu.memory_space<vmem>>, vector<2x1xf32>
    %37 = arith.addf %35, %36 : vector<2x1xf32>
    %c0_38 = arith.constant 0 : index
    %c0_39 = arith.constant 0 : index
    %c0_40 = arith.constant 0 : index
    %38 = vector.load %arg15[%c0_38, %c0_39, %c0_40] : memref<1x2x1xf32, #tpu.memory_space<vmem>>, vector<1x2x1xf32>
    %39 = vector.shape_cast %38 : vector<1x2x1xf32> to vector<2x1xf32>
    %40 = vector.shape_cast %37 : vector<2x1xf32> to vector<1x2x1xf32>
    tpu.vector_store %arg15[%c0_38, %c0_39, %c0_40], %40 {strides = array<i32>} : memref<1x2x1xf32, #tpu.memory_space<vmem>>, vector<1x2x1xf32>,
    return
  }
  func.func @transform_0(%arg0: i32) -> (i32, i32, i32) {
    %c0_i32 = arith.constant 0 : i32
    %c0_i32_0 = arith.constant 0 : i32
    %c0_i32_1 = arith.constant 0 : i32
    return %arg0, %c0_i32, %c0_i32_0 : i32, i32, i32
  }
  func.func @transform_1(%arg0: i32) -> (i32, i32) {
    %c0_i32 = arith.constant 0 : i32
    %c0_i32_0 = arith.constant 0 : i32
    %c0_i32_1 = arith.constant 0 : i32
    return %c0_i32, %c0_i32_0 : i32, i32
  }
  func.func @transform_2(%arg0: i32) -> (i32, i32) {
    %c0_i32 = arith.constant 0 : i32
    %c0_i32_0 = arith.constant 0 : i32
    %c0_i32_1 = arith.constant 0 : i32
    return %c0_i32, %c0_i32_0 : i32, i32
  }
  func.func @transform_3(%arg0: i32) -> (i32, i32) {
    %c0_i32 = arith.constant 0 : i32
    %c0_i32_0 = arith.constant 0 : i32
    %c0_i32_1 = arith.constant 0 : i32
    return %c0_i32, %c0_i32_0 : i32, i32
  }
  func.func @transform_4(%arg0: i32) -> (i32, i32) {
    %c0_i32 = arith.constant 0 : i32
    %c0_i32_0 = arith.constant 0 : i32
    %c0_i32_1 = arith.constant 0 : i32
    return %c0_i32, %c0_i32_0 : i32, i32
  }
  func.func @transform_5(%arg0: i32) -> (i32, i32) {
    %c0_i32 = arith.constant 0 : i32
    %c0_i32_0 = arith.constant 0 : i32
    %c0_i32_1 = arith.constant 0 : i32
    return %c0_i32, %c0_i32_0 : i32, i32
  }
  func.func @transform_6(%arg0: i32) -> (i32, i32) {
    %c0_i32 = arith.constant 0 : i32
    %c0_i32_0 = arith.constant 0 : i32
    %c0_i32_1 = arith.constant 0 : i32
    return %c0_i32, %c0_i32_0 : i32, i32
  }
  func.func @transform_7(%arg0: i32) -> (i32, i32) {
    %c0_i32 = arith.constant 0 : i32
    %c0_i32_0 = arith.constant 0 : i32
    %c0_i32_1 = arith.constant 0 : i32
    return %c0_i32, %c0_i32_0 : i32, i32
  }
  func.func @transform_8(%arg0: i32) -> (i32, i32) {
    %c0_i32 = arith.constant 0 : i32
    %c0_i32_0 = arith.constant 0 : i32
    %c0_i32_1 = arith.constant 0 : i32
    return %c0_i32, %c0_i32_0 : i32, i32
  }
  func.func @transform_9(%arg0: i32) -> (i32, i32) {
    %c0_i32 = arith.constant 0 : i32
    %c0_i32_0 = arith.constant 0 : i32
    %c0_i32_1 = arith.constant 0 : i32
    return %c0_i32, %c0_i32_0 : i32, i32
  }
  func.func @transform_10(%arg0: i32) -> (i32, i32) {
    %c0_i32 = arith.constant 0 : i32
    %c0_i32_0 = arith.constant 0 : i32
    %c0_i32_1 = arith.constant 0 : i32
    return %c0_i32, %c0_i32_0 : i32, i32
  }
  func.func @transform_11(%arg0: i32) -> (i32, i32) {
    %c0_i32 = arith.constant 0 : i32
    %c0_i32_0 = arith.constant 0 : i32
    %c0_i32_1 = arith.constant 0 : i32
    return %c0_i32, %c0_i32_0 : i32, i32
  }
  func.func @transform_12(%arg0: i32) -> (i32, i32) {
    %c0_i32 = arith.constant 0 : i32
    %c0_i32_0 = arith.constant 0 : i32
    %c0_i32_1 = arith.constant 0 : i32
    return %c0_i32, %c0_i32_0 : i32, i32
  }
  func.func @transform_13(%arg0: i32) -> (i32, i32, i32) {
    %c0_i32 = arith.constant 0 : i32
    %c0_i32_0 = arith.constant 0 : i32
    %c0_i32_1 = arith.constant 0 : i32
    return %arg0, %c0_i32, %c0_i32_0 : i32, i32, i32
  }
  func.func @transform_14(%arg0: i32) -> (i32, i32, i32) {
    %c0_i32 = arith.constant 0 : i32
    %c0_i32_0 = arith.constant 0 : i32
    %c0_i32_1 = arith.constant 0 : i32
    return %arg0, %c0_i32, %c0_i32_0 : i32, i32, i32
  }
}

</mosaic_0001>

<bundles_post_ra>
// kernel: tpu_custom_call.1
= control target key start
LH: loop header
LB: loop body
LE: loop exit
PB: predicated region body
PF: predicated region fallthrough
CT: control target
= control target key end

     0   :  { %s3413_s0 = inlined_call_operand.vmem [shape: f32[2,4,4096], index: 0, kind: input, shape index: {}]   ;;  %s3414_s1 = inlined_call_operand.vmem [shape: f32[2,4], index: 1, kind: input, shape index: {}]   ;;  %s3415_s2 = inlined_call_operand.vmem [shape: f32[2,1], index: 2, kind: input, shape index: {}]   ;;  %s3416_s3 = inlined_call_operand.vmem [shape: f32[8,4], index: 3, kind: input, shape index: {}]   ;;  %s3417_s4 = inlined_call_operand.vmem [shape: f32[8,1], index: 4, kind: input, shape index: {}]   ;;  %s3418_s5 = inlined_call_operand.vmem [shape: f32[128,8], index: 5, kind: input, shape index: {}]   ;;  %s3419_s6 = inlined_call_operand.vmem [shape: f32[128,1], index: 6, kind: input, shape index: {}]   ;;  %s3420_s7 = inlined_call_operand.vmem [shape: f32[256,128], index: 7, kind: input, shape index: {}]   ;;  %s3421_s8 = inlined_call_operand.vmem [shape: f32[256,1], index: 8, kind: input, shape index: {}]   ;;  %s3422_s9 = inlined_call_operand.hbm [shape: f32[64,256], index: 9, kind: input, shape index: {}]   ;;  %s3423_s10 = inlined_call_operand.vmem [shape: f32[64,1], index: 10, kind: input, shape index: {}]   ;;  %s3424_s11 = inlined_call_operand.vmem [shape: f32[2,64], index: 11, kind: input, shape index: {}]   ;;  %s3425_s12 = inlined_call_operand.vmem [shape: f32[2,1], index: 12, kind: input, shape index: {}]   ;;  %s3426_s13 = inlined_call_operand.hbm [shape: f32[2,2,4096], index: 13, kind: output, shape index: {0}]   ;;  %s3427_s14 = inlined_call_operand.vmem [shape: f32[2,2,1], index: 14, kind: output, shape index: {1}]  }
   0x1   :  { %3429 = sst [smem:[#allocation9_spill]] %s3413_s0 }
   0x2   :  { %3430 = sst [smem:[#allocation10_spill]] %s3414_s1 }
   0x3   :  { %3431 = sst [smem:[#allocation11_spill]] %s3415_s2 }
   0x4   :  { %3432 = sst [smem:[#allocation12_spill]] %s3416_s3 }
   0x5   :  { %3433 = sst [smem:[#allocation13_spill]] %s3417_s4 }
   0x6   :  { %3434 = sst [smem:[#allocation14_spill]] %s3418_s5 }
   0x7   :  { %3435 = sst [smem:[#allocation15_spill]] %s3422_s9 }
   0x8   :  { %20 = vsyncpa [#allocation3], 0 }
   0x9   :  { %21 = vsyncpa [#allocation4], 0 }
   0xa   :  { %23 = vsyncpa [#allocation4 + $0x1], 0  ;;  %s2531_s29 = smov 0   ;;  %s2533_s30 = smov 0  }
   0xb   :  { %s2535_s15 = smov 0   ;;  %s2537_s16 = smov 0  }
   0xc LB: > { %s2552_s17 = sadd.s32 4294967295, %s2450_s16   ;;  %s2184_s18 = sadd.s32 4294967294, %s2450_s16   ;;  %s2450_s16 = sphi %s2537_s16, %s3451_s16   ;;  %s2446_s15 = sphi %s2535_s15, %s3450_s15   ;;  %s2442_s30 = sphi %s2533_s30, %s3449_s30   ;;  %s2438_s29 = sphi %s2531_s29, %s3448_s29  }
   0xd   : > { %s2556_s19 = sadd.s32 1, %s2450_s16   ;;  %s314_s20 = sadd.s32 1, %s2446_s15 }
   0xe   : > { %s311_s21 = ssub.s32 %s2450_s16, %s2556_s19  ;;  %p324_p0 = scmp.ne.s32.totalorder %s2446_s15, %s2442_s30 }
   0xf   : > { %p312_p1 = scmp.eq.s32.totalorder %s311_s21, 0  ;;  %p325_p2 = scmp.eq.s32.totalorder %s2552_s17, 1 }
  0x10   : > { %p330_p3 = scmp.ne.s32.totalorder %s2442_s30, %s2438_s29  ;;  %p331_p4 = scmp.eq.s32.totalorder %s2184_s18, 1 }
  0x11   : > { %s2567_s22 = scalar_select %p312_p1, %s2446_s15, %s314_s20  }
  0x12   : > { %p2569_p5 = por %p325_p2, %p324_p0  ;;  %p2573_p6 = por %p331_p4, %p330_p3 }
  0x13   : > { %3436 = sst [smem:[#allocation8_spill]] %s2567_s22  ;;  %p2185_p7 = scmp.ge.s32.totalorder %s2450_s16, 1 }
  0x14   : > { %p364_p8 = scmp.lt.s32.totalorder %s2450_s16, 3  ;;  %p2314_p9 = scmp.eq.s32.totalorder %s2552_s17, 0 }
  0x15   : > { %s3439_s9 = sld [smem:[#allocation15_spill]]  ;;  %s2452_s28 = smov [#allocation2]  }
  0x16   : > { %p365_p10 = pnand %p2185_p7, %p364_p8  ;;  %s401_s18 = sshll.u32 %s2452_s28, 4  ;;  %s402_s18 = int_to_ptr.vmem [resolvable:$true] %s401_s18 }
  0x17   : > { %s2453_s20 = smov 256   ;;  %s2454_s21 = smov 16  }
  0x18   : > { %p2306_p11 = pneg %p365_p10  ;;  %434 = sbr.rel (%p365_p10) target bundleno = 1369 (0x559), region = 72 }
  0x1a   : > { %p2307_p12 = pnand %p2314_p9, %p2306_p11 }
  0x1b   : > { %s399_s27 = sshll.u32 %s3439_s9, 4  ;;  %s400_s27 = int_to_ptr.hbm [resolvable:$true] %s399_s27 }
  0x1c   : > { %2309 = dma.hbm_to_vmem [thread:$0]  (!%p2307_p12), %s400_s27, 2048, %s402_s18, [#allocation3], %s2453_s20, %s2453_s20, %s2454_s21  }
  0x1d   : > { %2429 = dma.done.wait (%p2314_p9), [#allocation3], 2048  }
  0x1e   : > { %2431 = vsyncadd (%p2314_p9), [#allocation3], 4294965248  ;;  %p485_p13 = scmp.lt.s32.totalorder %s2552_s17, 1  ;;  %s3440_s0 = sld [smem:[#allocation9_spill]]  ;;  %vm588_vm0 = vcmask 1043456   ;;  %vm584_vm1 = vcmask 31744  }
  0x1f   : > { %s3441_s1 = sld [smem:[#allocation10_spill]]  ;;  %vm1349_vm2 = vcmask 1041408   ;;  %vm1351_vm3 = vcmask 1045508   ;;  %vm1600_vm4 = vcmask 64512   ;;  %vm2039_vm5 = vcmask 523264   ;;  %s2283_s18 = sshll.u32 %s2552_s17, 6 }
  0x20   : > { %s2591_s25 = scalar_select %p485_p13, %s2552_s17, 1 }
  0x21   : > { %s3442_s2 = sld [smem:[#allocation11_spill]]  ;;  %s2404_s17 = scalar_lea.hbm %s3426_s13, 128 }
  0x22   : > { %s2282_s26 = sshll.u32 %s2591_s25, 7  ;;  %s3443_s3 = sld [smem:[#allocation12_spill]] }
  0x23   : > { %s3444_s4 = sld [smem:[#allocation13_spill]] }
  0x24   : > { %s2597_s22 = scalar_lea.vmem %s3440_s0, %s2282_s26  ;;  %s3428_s26 = sand.u32 1, %s2442_s30  }
  0x25   : > { %v2600_v0 = vld [vmem:[%s2597_s22] sm:$0xff]  ;;  %v2603_v1 = vld [vmem:[%s2597_s22 + $0x8] sm:$0xff]  ;;  %v2606_v2 = vld [vmem:[%s2597_s22 + $0x10] sm:$0xff]  ;;  %s2190_s28 = sshll.u32 %s3428_s26, 6  ;;  %s3445_s5 = sld [smem:[#allocation14_spill]] }
  0x26   : > { %v2609_v3 = vld [vmem:[%s2597_s22 + $0x18] sm:$0xff]  ;;  %533 = vst [vmem:[#allocation1] ss:$2 sm:$0xff] %v2600_v0  ;;  %v2616_v4 = vld [vmem:[%s2597_s22 + $0x20] sm:$0xff]  ;;  %v2619_v5 = vld [vmem:[%s2597_s22 + $0x28] sm:$0xff]  ;;  %s2922_s9 = scalar_lea.vmem [#allocation5], %s2190_s28  ;;  %s2081_s28 = scalar_lea.hbm %s3426_s13, %s2283_s18 }
  0x27   : > { %535 = vst [vmem:[#allocation1 + $0x10] ss:$2 sm:$0xff] %v2603_v1  ;;  %v2622_v7 = vld [vmem:[%s2597_s22 + $0x30] sm:$0xff]  ;;  %v2625_v10 = vld [vmem:[%s2597_s22 + $0x38] sm:$0xff]  ;;  %v2642_v16 = vld [vmem:[%s2597_s22 + $0x40] sm:$0xff]  ;;  %s2085_s27 = sshll.u32 %s2081_s28, 4  ;;  %s2086_s27 = int_to_ptr.hbm [resolvable:$true] %s2085_s27 }
  0x28   : > { %537 = vst [vmem:[#allocation1 + $0x20] ss:$2 sm:$0xff] %v2606_v2  ;;  %v2645_v17 = vld [vmem:[%s2597_s22 + $0x48] sm:$0xff]  ;;  %v2648_v19 = vld [vmem:[%s2597_s22 + $0x50] sm:$0xff]  ;;  %v2663_v26 = vld [vmem:[%s2597_s22 + $0x58] sm:$0xff] }
  0x29   : > { %539 = vst [vmem:[#allocation1 + $0x30] ss:$2 sm:$0xff] %v2609_v3  ;;  %v2672_v28 = vld [vmem:[%s2597_s22 + $0x60] sm:$0xff]  ;;  %v2675_v29 = vld [vmem:[%s2597_s22 + $0x68] sm:$0xff]  ;;  %v2680_v31 = vld [vmem:[%s2597_s22 + $0x70] sm:$0xff] }
  0x2a   : > { %v2695_v38 = vld [vmem:[%s2597_s22 + $0x78] sm:$0xff]  ;;  %s2083_s22 = sshll.u32 %s2922_s9, 4  ;;  %s2084_s22 = int_to_ptr.vmem [resolvable:$true] %s2083_s22 }
  0x2d   : > { %v540_v6 = vld.sshfl [vmem:[#allocation1] sm:$0xff pattern:$0x75316420]  ;;  %v541_v8 = vld.sshfl [vmem:[#allocation1 + $0x8] sm:$0xff pattern:$0x75316420] }
  0x2e   : > { %v542_v9 = vld.sshfl [vmem:[#allocation1 + $0x10] sm:$0xff pattern:$0x75316420]  ;;  %v2627_v11 = vld.sshfl [vmem:[#allocation1 + $0x18] sm:$0xff pattern:$0x75316420]  ;;  %2194 = vmatpush.msk.msra.mxu1 %vm588_vm0, %v540_v6 }
  0x2f   : > { %v544_v12 = vld.sshfl [vmem:[#allocation1 + $0x20] sm:$0xff pattern:$0x75316420]  ;;  %v2629_v13 = vld.sshfl [vmem:[#allocation1 + $0x28] sm:$0xff pattern:$0x75316420]  ;;  %2198 = vmatpush.msk.msra.mxu2 %vm588_vm0, %v542_v9 }
  0x30   : > { %v546_v14 = vld.sshfl [vmem:[#allocation1 + $0x30] sm:$0xff pattern:$0x75316420]  ;;  %v547_v15 = vld.sshfl [vmem:[#allocation1 + $0x38] sm:$0xff pattern:$0x75316420]  ;;  %2196 = vmatpush.msk.msrb.mxu1 %vm588_vm0, %v541_v8  ;;  %2202 = vmatpush.msk.msra.mxu0 %vm588_vm0, %v544_v12 }
  0x31   : > { %548 = vst [vmem:[#allocation1] ss:$2 sm:$0xff] %v2616_v4  ;;  %2206 = vmatpush.msk.msrb.mxu2 %vm588_vm0, %v546_v14  ;;  %2208 = vmatpush.msk.msra.mxu3 %vm588_vm0, %v547_v15 }
  0x32   : > { %549 = vst [vmem:[#allocation1 + $0x10] ss:$2 sm:$0xff] %v2619_v5 }
  0x33   : > { %550 = vst [vmem:[#allocation1 + $0x20] ss:$2 sm:$0xff] %v2622_v7 }
  0x34   : > { %551 = vst [vmem:[#allocation1 + $0x30] ss:$2 sm:$0xff] %v2625_v10 }
  0x38   : > { %v552_v18 = vld.sshfl [vmem:[#allocation1] sm:$0xff pattern:$0x75316420]  ;;  %v2650_v20 = vld.sshfl [vmem:[#allocation1 + $0x8] sm:$0xff pattern:$0x75316420] }
  0x39   : > { %v555_v21 = vld.sshfl [vmem:[#allocation1 + $0x18] sm:$0xff pattern:$0x75316420]  ;;  %2210 = vmatpush.msk.msrb.mxu0 %vm588_vm0, %v552_v18  ;;  %v2653_v22 = vld.sshfl [vmem:[#allocation1 + $0x10] sm:$0xff pattern:$0x75316420] }
  0x3a   : > { %v2655_v23 = vld.sshfl [vmem:[#allocation1 + $0x20] sm:$0xff pattern:$0x75316420]  ;;  %2216 = vmatpush.msk.msrb.mxu3 %vm588_vm0, %v555_v21  ;;  %v2658_v24 = vld.sshfl [vmem:[#allocation1 + $0x28] sm:$0xff pattern:$0x75316420] }
  0x3b   : > { %v2660_v25 = vld.sshfl [vmem:[#allocation1 + $0x30] sm:$0xff pattern:$0x75316420]  ;;  %v2665_v27 = vld.sshfl [vmem:[#allocation1 + $0x38] sm:$0xff pattern:$0x75316420] }
  0x3c   : > { %560 = vst [vmem:[#allocation1] ss:$2 sm:$0xff] %v2642_v16 }
  0x3d   : > { %561 = vst [vmem:[#allocation1 + $0x10] ss:$2 sm:$0xff] %v2645_v17 }
  0x3e   : > { %562 = vst [vmem:[#allocation1 + $0x20] ss:$2 sm:$0xff] %v2648_v19 }
  0x3f   : > { %563 = vst [vmem:[#allocation1 + $0x30] ss:$2 sm:$0xff] %v2663_v26 }
  0x43   : > { %v2677_v30 = vld.sshfl [vmem:[#allocation1] sm:$0xff pattern:$0x75316420]  ;;  %v2682_v32 = vld.sshfl [vmem:[#allocation1 + $0x8] sm:$0xff pattern:$0x75316420] }
  0x44   : > { %v2684_v33 = vld.sshfl [vmem:[#allocation1 + $0x10] sm:$0xff pattern:$0x75316420]  ;;  %v2686_v34 = vld.sshfl [vmem:[#allocation1 + $0x18] sm:$0xff pattern:$0x75316420] }
  0x45   : > { %v2688_v35 = vld.sshfl [vmem:[#allocation1 + $0x20] sm:$0xff pattern:$0x75316420]  ;;  %v2690_v36 = vld.sshfl [vmem:[#allocation1 + $0x28] sm:$0xff pattern:$0x75316420] }
  0x46   : > { %v2692_v37 = vld.sshfl [vmem:[#allocation1 + $0x30] sm:$0xff pattern:$0x75316420]  ;;  %v2697_v39 = vld.sshfl [vmem:[#allocation1 + $0x38] sm:$0xff pattern:$0x75316420] }
  0x47   : > { %572 = vst [vmem:[#allocation1] ss:$2 sm:$0xff] %v2672_v28 }
  0x48   : > { %573 = vst [vmem:[#allocation1 + $0x10] ss:$2 sm:$0xff] %v2675_v29 }
  0x49   : > { %574 = vst [vmem:[#allocation1 + $0x20] ss:$2 sm:$0xff] %v2680_v31 }
  0x4a   : > { %575 = vst [vmem:[#allocation1 + $0x30] ss:$2 sm:$0xff] %v2695_v38 }
  0x4e   : > { %v2703_v40 = vld.sshfl [vmem:[#allocation1] sm:$0xff pattern:$0x75316420]  ;;  %v2705_v41 = vld.sshfl [vmem:[#allocation1 + $0x8] sm:$0xff pattern:$0x75316420] }
  0x4f   : > { %v2707_v42 = vld.sshfl [vmem:[#allocation1 + $0x10] sm:$0xff pattern:$0x75316420]  ;;  %v2709_v43 = vld.sshfl [vmem:[#allocation1 + $0x18] sm:$0xff pattern:$0x75316420] }
  0x50   : > { %v2711_v44 = vld.sshfl [vmem:[#allocation1 + $0x20] sm:$0xff pattern:$0x75316420]  ;;  %v2713_v45 = vld.sshfl [vmem:[#allocation1 + $0x28] sm:$0xff pattern:$0x75316420] }
  0x51   : > { %v2715_v46 = vld.sshfl [vmem:[#allocation1 + $0x30] sm:$0xff pattern:$0x75316420]  ;;  %v2717_v47 = vld.sshfl [vmem:[#allocation1 + $0x38] sm:$0xff pattern:$0x75316420] }
  0x52   : > { %1391 = vst [vmem:[#allocation1] ss:$2 sm:$0xff] %v2600_v0 }
  0x53   : > { %1393 = vst [vmem:[#allocation1 + $0x10] ss:$2 sm:$0xff] %v2603_v1 }
  0x54   : > { %1395 = vst [vmem:[#allocation1 + $0x20] ss:$2 sm:$0xff] %v2606_v2 }
  0x55   : > { %1397 = vst [vmem:[#allocation1 + $0x30] ss:$2 sm:$0xff] %v2609_v3 }
  0x59   : > { %v1398_v48 = vld.sshfl [vmem:[#allocation1] sm:$0xff pattern:$0x75316420]  ;;  %v1399_v49 = vld.sshfl [vmem:[#allocation1 + $0x8] sm:$0xff pattern:$0x75316420] }
  0x5a   : > { %v1400_v50 = vld.sshfl [vmem:[#allocation1 + $0x10] sm:$0xff pattern:$0x75316420]  ;;  %v1401_v51 = vld.sshfl [vmem:[#allocation1 + $0x18] sm:$0xff pattern:$0x75316420] }
  0x5b   : > { %v1402_v52 = vld.sshfl [vmem:[#allocation1 + $0x20] sm:$0xff pattern:$0x75316420]  ;;  %v1403_v53 = vld.sshfl [vmem:[#allocation1 + $0x28] sm:$0xff pattern:$0x75316420] }
  0x5c   : > { %1406 = vst [vmem:[#allocation1] ss:$2 sm:$0xff] %v2616_v4  ;;  %v1474_v54 = vsel %vm588_vm0, %v1398_v48, 0.0  ;;  %v1475_v55 = vsel %vm588_vm0, %v1399_v49, 0.0  ;;  %v1477_v56 = vsel %vm588_vm0, %v1400_v50, 0.0  ;;  %v1479_v60 = vsel %vm588_vm0, %v1401_v51, 0.0 }
  0x5d   : > { %v1404_v57 = vld.sshfl [vmem:[#allocation1 + $0x30] sm:$0xff pattern:$0x75316420]  ;;  %1407 = vst [vmem:[#allocation1 + $0x10] ss:$2 sm:$0xff] %v2619_v5  ;;  %v1476_v58 = vadd.f32 %v1475_v55, %v1474_v54  ;;  %v1481_v62 = vsel %vm588_vm0, %v1402_v52, 0.0 }
  0x5e   : > { %v1405_v59 = vld.sshfl [vmem:[#allocation1 + $0x38] sm:$0xff pattern:$0x75316420]  ;;  %1408 = vst [vmem:[#allocation1 + $0x20] ss:$2 sm:$0xff] %v2622_v7  ;;  %v1483_v0 = vsel %vm588_vm0, %v1403_v53, 0.0 }
  0x5f   : > { %1409 = vst [vmem:[#allocation1 + $0x30] ss:$2 sm:$0xff] %v2625_v10  ;;  %v1478_v61 = vadd.f32 %v1477_v56, %v1476_v58  ;;  %v1485_v3 = vsel %vm588_vm0, %v1404_v57, 0.0  ;;  %v1487_v4 = vsel %vm588_vm0, %v1405_v59, 0.0 }
  0x61   : > { %v1480_v63 = vadd.f32 %v1479_v60, %v1478_v61 }
  0x63   : > { %v1482_v1 = vadd.f32 %v1481_v62, %v1480_v63  ;;  %v1410_v2 = vld.sshfl [vmem:[#allocation1] sm:$0xff pattern:$0x75316420]  ;;  %v1411_v5 = vld.sshfl [vmem:[#allocation1 + $0x8] sm:$0xff pattern:$0x75316420] }
  0x64   : > { %v1412_v6 = vld.sshfl [vmem:[#allocation1 + $0x10] sm:$0xff pattern:$0x75316420]  ;;  %v1413_v7 = vld.sshfl [vmem:[#allocation1 + $0x18] sm:$0xff pattern:$0x75316420] }
  0x65   : > { %v1484_v8 = vadd.f32 %v1483_v0, %v1482_v1  ;;  %v1414_v9 = vld.sshfl [vmem:[#allocation1 + $0x20] sm:$0xff pattern:$0x75316420]  ;;  %v1415_v12 = vld.sshfl [vmem:[#allocation1 + $0x28] sm:$0xff pattern:$0x75316420] }
  0x66   : > { %1418 = vst [vmem:[#allocation1] ss:$2 sm:$0xff] %v2642_v16  ;;  %v1416_v14 = vld.sshfl [vmem:[#allocation1 + $0x30] sm:$0xff pattern:$0x75316420]  ;;  %v1489_v15 = vsel %vm588_vm0, %v1410_v2, 0.0 }
  0x67   : > { %v1486_v10 = vadd.f32 %v1485_v3, %v1484_v8  ;;  %1419 = vst [vmem:[#allocation1 + $0x10] ss:$2 sm:$0xff] %v2645_v17  ;;  %v1417_v18 = vld.sshfl [vmem:[#allocation1 + $0x38] sm:$0xff pattern:$0x75316420]  ;;  %v1491_v48 = vsel %vm588_vm0, %v1411_v5, 0.0 }
  0x68   : > { %1420 = vst [vmem:[#allocation1 + $0x20] ss:$2 sm:$0xff] %v2648_v19  ;;  %v1493_v50 = vsel %vm588_vm0, %v1412_v6, 0.0  ;;  %v1495_v16 = vsel %vm588_vm0, %v1413_v7, 0.0  ;;  %v1497_v17 = vsel %vm588_vm0, %v1414_v9, 0.0  ;;  %v1501_v62 = vsel %vm588_vm0, %v1416_v14, 0.0 }
  0x69   : > { %v1488_v21 = vadd.f32 %v1487_v4, %v1486_v10  ;;  %1421 = vst [vmem:[#allocation1 + $0x30] ss:$2 sm:$0xff] %v2663_v26  ;;  %v1499_v26 = vsel %vm588_vm0, %v1415_v12, 0.0  ;;  %v1503_v0 = vsel %vm588_vm0, %v1417_v18, 0.0  ;;  %v2455_v10 = vmov 0  }
  0x6a   : > { %2353 = vset.pattern.permute.xlu0 %v2455_v10 }
  0x6b   : > { %v1490_v49 = vadd.f32 %v1489_v15, %v1488_v21 }
  0x6d   : > { %v1492_v51 = vadd.f32 %v1491_v48, %v1490_v49  ;;  %v1422_v52 = vld.sshfl [vmem:[#allocation1] sm:$0xff pattern:$0x75316420]  ;;  %v1423_v54 = vld.sshfl [vmem:[#allocation1 + $0x8] sm:$0xff pattern:$0x75316420] }
  0x6e   : > { %v1424_v55 = vld.sshfl [vmem:[#allocation1 + $0x10] sm:$0xff pattern:$0x75316420]  ;;  %v1425_v56 = vld.sshfl [vmem:[#allocation1 + $0x18] sm:$0xff pattern:$0x75316420] }
  0x6f   : > { %v1494_v53 = vadd.f32 %v1493_v50, %v1492_v51  ;;  %v1426_v57 = vld.sshfl [vmem:[#allocation1 + $0x20] sm:$0xff pattern:$0x75316420]  ;;  %v1427_v58 = vld.sshfl [vmem:[#allocation1 + $0x28] sm:$0xff pattern:$0x75316420] }
  0x70   : > { %1430 = vst [vmem:[#allocation1] ss:$2 sm:$0xff] %v2672_v28  ;;  %v1428_v59 = vld.sshfl [vmem:[#allocation1 + $0x30] sm:$0xff pattern:$0x75316420]  ;;  %v1505_v2 = vsel %vm588_vm0, %v1422_v52, 0.0 }
  0x71   : > { %v1496_v19 = vadd.f32 %v1495_v16, %v1494_v53  ;;  %1431 = vst [vmem:[#allocation1 + $0x10] ss:$2 sm:$0xff] %v2675_v29  ;;  %v1429_v61 = vld.sshfl [vmem:[#allocation1 + $0x38] sm:$0xff pattern:$0x75316420]  ;;  %v1507_v3 = vsel %vm588_vm0, %v1423_v54, 0.0 }
  0x72   : > { %1432 = vst [vmem:[#allocation1 + $0x20] ss:$2 sm:$0xff] %v2680_v31  ;;  %v1509_v29 = vsel %vm588_vm0, %v1424_v55, 0.0  ;;  %v2757_v31 = vld [vmem:[%s3441_s1] sm:$0x3]  ;;  %v1513_v8 = vsel %vm588_vm0, %v1426_v57, 0.0 }
  0x73   : > { %v1498_v60 = vadd.f32 %v1497_v17, %v1496_v19  ;;  %1433 = vst [vmem:[#allocation1 + $0x30] ss:$2 sm:$0xff] %v2695_v38  ;;  %v1511_v38 = vsel %vm588_vm0, %v1425_v56, 0.0  ;;  %2195 = vmatmul.msk.f32.vlgmr.msra.gmra.mxu1 %vm584_vm1, %v2757_v31  ;;  %2199 = vmatmul.msk.f32.vlgmr.msra.gmra.mxu2 %vm584_vm1, %v2757_v31  ;;  %v1515_v9 = vsel %vm588_vm0, %v1427_v58, 0.0  ;;  %v1517_v14 = vsel %vm588_vm0, %v1428_v59, 0.0  ;;  %s3446_s1 = sand.u32 1, %s2442_s30  }
  0x74   : > { %2200 = vmatpush.msk.msra.mxu1 %vm588_vm0, %v2627_v11  ;;  %2209 = vmatmul.msk.f32.vlgmr.msra.gmra.mxu3 %vm584_vm1, %v2757_v31  ;;  %v1519_v18 = vsel %vm588_vm0, %v1429_v61, 0.0 }
  0x75   : > { %v1500_v63 = vadd.f32 %v1499_v26, %v1498_v60  ;;  %2214 = vmatpush.msk.msra.mxu2 %vm588_vm0, %v2653_v22  ;;  %2203 = vmatmul.msk.f32.vlgmr.msra.gmra.mxu0 %vm584_vm1, %v2757_v31 }
  0x76   : > { %2224 = vmatpush.msk.msra.mxu3 %vm588_vm0, %v2665_v27  ;;  %2218 = vmatpush.msk.msra.mxu0 %vm588_vm0, %v2655_v23 }
  0x77   : > { %v1502_v1 = vadd.f32 %v1501_v62, %v1500_v63  ;;  %v1434_v11 = vld.sshfl [vmem:[#allocation1] sm:$0xff pattern:$0x75316420]  ;;  %v1435_v21 = vld.sshfl [vmem:[#allocation1 + $0x8] sm:$0xff pattern:$0x75316420] }
  0x78   : > { %v1521_v48 = vsel %vm588_vm0, %v1434_v11, 0.0  ;;  %v1436_v27 = vld.sshfl [vmem:[#allocation1 + $0x10] sm:$0xff pattern:$0x75316420]  ;;  %v1523_v23 = vsel %vm588_vm0, %v1435_v21, 0.0 }
  0x79   : > { %v1504_v28 = vadd.f32 %v1503_v0, %v1502_v1  ;;  %v1437_v50 = vld.sshfl [vmem:[#allocation1 + $0x18] sm:$0xff pattern:$0x75316420]  ;;  %v1438_v16 = vld.sshfl [vmem:[#allocation1 + $0x20] sm:$0xff pattern:$0x75316420] }
  0x7a   : > { %v1527_v53 = vsel %vm588_vm0, %v1437_v50, 0.0  ;;  %v1439_v17 = vld.sshfl [vmem:[#allocation1 + $0x28] sm:$0xff pattern:$0x75316420] }
  0x7b   : > { %v1506_v4 = vadd.f32 %v1505_v2, %v1504_v28  ;;  %2197 = vmatmul.msk.f32.vlgmr.msrb.gmra.mxu1 %vm584_vm1, %v2757_v31  ;;  %2207 = vmatmul.msk.f32.vlgmr.msrb.gmra.mxu2 %vm584_vm1, %v2757_v31  ;;  %v1441_v56 = vld.sshfl [vmem:[#allocation1 + $0x38] sm:$0xff pattern:$0x75316420] }
  0x7c   : > { %2204 = vmatpush.msk.msrb.mxu1 %vm588_vm0, %v2629_v13  ;;  %2217 = vmatmul.msk.f32.vlgmr.msrb.gmra.mxu3 %vm584_vm1, %v2757_v31  ;;  %v1525_v13 = vsel %vm588_vm0, %v1436_v27, 0.0  ;;  %v1535_v58 = vsel %vm588_vm0, %v1441_v56, 0.0 }
  0x7d   : > { %v1508_v5 = vadd.f32 %v1507_v3, %v1506_v4  ;;  %2222 = vmatpush.msk.msrb.mxu2 %vm588_vm0, %v2660_v25  ;;  %2211 = vmatmul.msk.f32.vlgmr.msrb.gmra.mxu0 %vm584_vm1, %v2757_v31  ;;  %v1529_v25 = vsel %vm588_vm0, %v1438_v16, 0.0 }
  0x7e   : > { %2232 = vmatpush.msk.msrb.mxu3 %vm588_vm0, %v2686_v34  ;;  %2226 = vmatpush.msk.msrb.mxu0 %vm588_vm0, %v2677_v30  ;;  %v1440_v34 = vld.sshfl [vmem:[#allocation1 + $0x30] sm:$0xff pattern:$0x75316420]  ;;  %v1531_v30 = vsel %vm588_vm0, %v1439_v17, 0.0 }
  0x7f   : > { %v1510_v6 = vadd.f32 %v1509_v29, %v1508_v5 }
  0x81   : > { %v1512_v7 = vadd.f32 %v1511_v38, %v1510_v6 }
  0x83   : > { %v1514_v12 = vadd.f32 %v1513_v8, %v1512_v7  ;;  %2201 = vmatmul.msk.f32.vlgmr.msra.gmra.mxu1 %vm584_vm1, %v2757_v31  ;;  %2215 = vmatmul.msk.f32.vlgmr.msra.gmra.mxu2 %vm584_vm1, %v2757_v31 }
  0x84   : > { %2212 = vmatpush.msk.msra.mxu1 %vm588_vm0, %v2650_v20  ;;  %2225 = vmatmul.msk.f32.vlgmr.msra.gmra.mxu3 %vm584_vm1, %v2757_v31  ;;  %v1533_v20 = vsel %vm588_vm0, %v1440_v34, 0.0 }
  0x85   : > { %v1516_v15 = vadd.f32 %v1515_v9, %v1514_v12  ;;  %2230 = vmatpush.msk.msra.mxu2 %vm588_vm0, %v2684_v33  ;;  %2219 = vmatmul.msk.f32.vlgmr.msra.gmra.mxu0 %vm584_vm1, %v2757_v31 }
  0x86   : > { %2240 = vmatpush.msk.msra.mxu3 %vm588_vm0, %v2697_v39  ;;  %2234 = vmatpush.msk.msra.mxu0 %vm588_vm0, %v2688_v35 }
  0x87   : > { %v1518_v22 = vadd.f32 %v1517_v14, %v1516_v15 }
  0x89   : > { %v1520_v49 = vadd.f32 %v1519_v18, %v1518_v22 }
  0x8b   : > { %v1522_v51 = vadd.f32 %v1521_v48, %v1520_v49  ;;  %2205 = vmatmul.msk.f32.vlgmr.msrb.gmra.mxu1 %vm584_vm1, %v2757_v31  ;;  %2223 = vmatmul.msk.f32.vlgmr.msrb.gmra.mxu2 %vm584_vm1, %v2757_v31 }
  0x8c   : > { %2220 = vmatpush.msk.msrb.mxu1 %vm588_vm0, %v2658_v24  ;;  %2233 = vmatmul.msk.f32.vlgmr.msrb.gmra.mxu3 %vm584_vm1, %v2757_v31  ;;  %v511_v24 = vld [vmem:[%s3442_s2] sm:$0x3]  ;;  %s2066_s2 = scalar_lea.sflag [#allocation4], %s3446_s1 }
  0x8d   : > { %v1524_v52 = vadd.f32 %v1523_v23, %v1522_v51  ;;  %2238 = vmatpush.msk.msrb.mxu2 %vm588_vm0, %v2692_v37  ;;  %2227 = vmatmul.msk.f32.vlgmr.msrb.gmra.mxu0 %vm584_vm1, %v2757_v31 }
  0x8e   : > { %2248 = vmatpush.msk.msrb.mxu3 %vm588_vm0, %v2709_v43  ;;  %2242 = vmatpush.msk.msrb.mxu0 %vm588_vm0, %v2703_v40 }
  0x8f   : > { %v1526_v54 = vadd.f32 %v1525_v13, %v1524_v52 }
  0x91   : > { %v1528_v55 = vadd.f32 %v1527_v53, %v1526_v54 }
  0x93   : > { %v1530_v57 = vadd.f32 %v1529_v25, %v1528_v55  ;;  %2213 = vmatmul.msk.f32.vlgmr.msra.gmra.mxu1 %vm584_vm1, %v2757_v31  ;;  %2231 = vmatmul.msk.f32.vlgmr.msra.gmra.mxu2 %vm584_vm1, %v2757_v31 }
  0x94   : > { %2228 = vmatpush.msk.msra.mxu1 %vm588_vm0, %v2682_v32  ;;  %2241 = vmatmul.msk.f32.vlgmr.msra.gmra.mxu3 %vm584_vm1, %v2757_v31 }
  0x95   : > { %v1532_v19 = vadd.f32 %v1531_v30, %v1530_v57  ;;  %2246 = vmatpush.msk.msra.mxu2 %vm588_vm0, %v2707_v42  ;;  %2235 = vmatmul.msk.f32.vlgmr.msra.gmra.mxu0 %vm584_vm1, %v2757_v31 }
  0x96   : > { %2256 = vmatpush.msk.msra.mxu3 %vm588_vm0, %v2717_v47  ;;  %2250 = vmatpush.msk.msra.mxu0 %vm588_vm0, %v2711_v44 }
  0x97   : > { %v1534_v26 = vadd.f32 %v1533_v20, %v1532_v19 }
  0x99   : > { %v1536_v33 = vadd.f32 %v1535_v58, %v1534_v26 }
  0x9b   : > { %1537 = vadd.xlane.f32.xlu0 %v1536_v33  ;;  %2221 = vmatmul.msk.f32.vlgmr.msrb.gmra.mxu1 %vm584_vm1, %v2757_v31 }
  0x9c   : > { %2239 = vmatmul.msk.f32.vlgmr.msrb.gmra.mxu2 %vm584_vm1, %v2757_v31  ;;  %2236 = vmatpush.msk.msrb.mxu1 %vm588_vm0, %v2690_v36 }
  0x9d   : > { %2249 = vmatmul.msk.f32.vlgmr.msrb.gmra.mxu3 %vm584_vm1, %v2757_v31  ;;  %2254 = vmatpush.msk.msrb.mxu2 %vm588_vm0, %v2715_v46 }
  0x9e   : > { %2243 = vmatmul.msk.f32.vlgmr.msrb.gmra.mxu0 %vm584_vm1, %v2757_v31 }
  0xa3   : > { %2229 = vmatmul.msk.f32.vlgmr.msra.gmra.mxu1 %vm584_vm1, %v2757_v31 }
  0xa4   : > { %2247 = vmatmul.msk.f32.vlgmr.msra.gmra.mxu2 %vm584_vm1, %v2757_v31  ;;  %2244 = vmatpush.msk.msra.mxu1 %vm588_vm0, %v2705_v41 }
  0xa5   : > { %2257 = vmatmul.msk.f32.vlgmr.msra.gmra.mxu3 %vm584_vm1, %v2757_v31 }
  0xa6   : > { %2251 = vmatmul.msk.f32.vlgmr.msra.gmra.mxu0 %vm584_vm1, %v2757_v31 }
  0xab   : > { %2237 = vmatmul.msk.f32.vlgmr.msrb.gmra.mxu1 %vm584_vm1, %v2757_v31 }
  0xac   : > { %2255 = vmatmul.msk.f32.vlgmr.msrb.gmra.mxu2 %vm584_vm1, %v2757_v31  ;;  %2252 = vmatpush.msk.msrb.mxu1 %vm588_vm0, %v2713_v45  ;;  %v1540_v45 = vld [vmem:[%s3443_s3] sm:$0xff]  ;;  %s2398_s3 = sshra.s32 %s2086_s27, 4  ;;  %s2399_s3 = int_to_ptr.hbm [resolvable:$true] %s2398_s3 }
  0xad   : > { %p2405_p3 = scmp.lt.s32.totalorder %s2399_s3, %s3426_s13 }
  0xaf   : > { %514 = vperm.xlu0 %2353, %v511_v24  }
  0xb3   : > { %2245 = vmatmul.msk.f32.vlgmr.msra.gmra.mxu1 %vm584_vm1, %v2757_v31 }
  0xbb   : > { %2253 = vmatmul.msk.f32.vlgmr.msrb.gmra.mxu1 %vm584_vm1, %v2757_v31 }
  0xf0   : > { %v2887_v32 = vpop.f32.mrf.mxu1 }
  0xf2   : > { %v750_v39 = vpop.f32.mrf.mxu0 }
  0xf6   : > { %v2889_v35 = vpop.f32.mrf.mxu2 }
  0xf7   : > { %v810_v36 = vpop.f32.mrf.mxu3 }
  0xf8   : > { %v2891_v37 = vpop.f32.mrf.mxu1 }
  0xfa   : > { %v830_v46 = vpop.f32.mrf.mxu0 }
  0xfe   : > { %v790_v40 = vpop.f32.mrf.mxu2 }
  0xff   : > { %v890_v41 = vpop.f32.mrf.mxu3 }
 0x100   : > { %v2893_v42 = vpop.f32.mrf.mxu1 }
 0x102   : > { %v910_v62 = vpop.f32.mrf.mxu0 }
 0x106   : > { %v870_v47 = vpop.f32.mrf.mxu2 }
 0x107   : > { %v970_v59 = vpop.f32.mrf.mxu3 }
 0x108   : > { %v770_v60 = vpop.f32.mrf.mxu1 }
 0x10a   : > { %v990_v11 = vpop.f32.mrf.mxu0 }
 0x10e   : > { %v1538_v43 = vpop.xlane.xlu0 %1537  ;;  %v950_v61 = vpop.f32.mrf.mxu2 }
 0x10f   : > { %v1539_v44 = vmul.f32 0.00024414063, %v1538_v43  ;;  %v1050_v0 = vpop.f32.mrf.mxu3 }
 0x110   : > { %v850_v63 = vpop.f32.mrf.mxu1 }
 0x111   : > { %2258 = vmatpush.msk.msrb.mxu0 %vm588_vm0, %v1539_v44 }
 0x112   : > { %2259 = vmatmul.msk.f32.vlgmr.msrb.gmra.mxu0 %vm584_vm1, %v1540_v45  ;;  %v1070_v33 = vpop.f32.mrf.mxu0 }
 0x116   : > { %v1030_v31 = vpop.f32.mrf.mxu2 }
 0x117   : > { %v1130_v16 = vpop.f32.mrf.mxu3 }
 0x118   : > { %v930_v14 = vpop.f32.mrf.mxu1 }
 0x11f   : > { %v1110_v30 = vpop.f32.mrf.mxu2 }
 0x120   : > { %v1010_v19 = vpop.f32.mrf.mxu1  ;;  %v1210_v43 = vpop.f32.mrf.mxu3 }
 0x121   : > { %v2901_v1 = vpop.permute.xlu0 %514 }
 0x122   : > { %v751_v2 = vadd.f32 %v750_v39, %v2901_v1  ;;  %v771_v28 = vadd.f32 %v770_v60, %v2901_v1  ;;  %v791_v3 = vadd.f32 %v790_v40, %v2901_v1  ;;  %v811_v4 = vadd.f32 %v810_v36, %v2901_v1 }
 0x123   : > { %v851_v29 = vadd.f32 %v850_v63, %v2901_v1  ;;  %v871_v5 = vadd.f32 %v870_v47, %v2901_v1  ;;  %v891_v6 = vadd.f32 %v890_v41, %v2901_v1  ;;  %v831_v8 = vadd.f32 %v830_v46, %v2901_v1 }
 0x124   : > { %v1328_v38 = vrot.slane %v771_v28, 6  ;;  %v1329_v7 = vrot.slane %v791_v3, 4  ;;  %v1330_v9 = vrot.slane %v811_v4, 2  ;;  %v931_v21 = vadd.f32 %v930_v14, %v2901_v1  ;;  %v1150_v28 = vpop.f32.mrf.mxu0 }
 0x125   : > { %v1331_v12 = vrot.slane %v851_v29, 6  ;;  %v1332_v10 = vrot.slane %v871_v5, 4  ;;  %v1333_v18 = vrot.slane %v891_v6, 2  ;;  %v951_v27 = vadd.f32 %v950_v61, %v2901_v1 }
 0x126   : > { %v1354_v15 = vsel %vm1349_vm2, %v751_v2, %v1328_v38  ;;  %v1355_v22 = vsel %vm1351_vm3, %v1329_v7, %v1330_v9  ;;  %v971_v49 = vadd.f32 %v970_v59, %v2901_v1  ;;  %v1334_v51 = vrot.slane %v931_v21, 6 }
 0x127   : > { %v1357_v48 = vsel %vm1349_vm2, %v831_v8, %v1331_v12  ;;  %v1356_v23 = vsel %vm588_vm0, %v1354_v15, %v1355_v22  ;;  %v1358_v50 = vsel %vm1351_vm3, %v1332_v10, %v1333_v18  ;;  %v911_v13 = vadd.f32 %v910_v62, %v2901_v1  ;;  %v1190_v45 = vpop.f32.mrf.mxu2 }
 0x128   : > { %1384 = vst [vmem:[%s2922_s9 + $0x8] sm:$0xff] %v1356_v23  ;;  %v1359_v52 = vsel %vm588_vm0, %v1357_v48, %v1358_v50  ;;  %v1335_v53 = vrot.slane %v951_v27, 4  ;;  %v1336_v17 = vrot.slane %v971_v49, 2  ;;  %v1031_v54 = vadd.f32 %v1030_v31, %v2901_v1  ;;  %v1090_v59 = vpop.f32.mrf.mxu1  ;;  %v1290_v31 = vpop.f32.mrf.mxu3 }
 0x129   : > { %1385 = vst [vmem:[%s2922_s9 + $0x10] sm:$0xff] %v1359_v52  ;;  %v1360_v25 = vsel %vm1349_vm2, %v911_v13, %v1334_v51  ;;  %v1051_v34 = vadd.f32 %v1050_v0, %v2901_v1  ;;  %v1011_v58 = vadd.f32 %v1010_v19, %v2901_v1  ;;  %v991_v26 = vadd.f32 %v990_v11, %v2901_v1 }
 0x12a   : > { %v1361_v55 = vsel %vm1351_vm3, %v1335_v53, %v1336_v17  ;;  %v1338_v57 = vrot.slane %v1031_v54, 4  ;;  %v1111_v39 = vadd.f32 %v1110_v30, %v2901_v1  ;;  %v1131_v40 = vadd.f32 %v1130_v16, %v2901_v1  ;;  %v1541_v16 = vld [vmem:[%s3444_s4] sm:$0xff]  ;;  %v1569_v54 = vld [vmem:[%s3445_s5 + $0x8] sm:$0xff]  ;;  %v1570_v30 = vld [vmem:[%s3445_s5 + $0x10] sm:$0xff]  ;;  %s2400_s4 = scalar_lea.hbm %s2399_s3, 64 }
 0x12b   : > { %v1362_v56 = vsel %vm588_vm0, %v1360_v25, %v1361_v55  ;;  %v1339_v20 = vrot.slane %v1051_v34, 2  ;;  %v1337_v24 = vrot.slane %v1011_v58, 6  ;;  %v1091_v60 = vadd.f32 %v1090_v59, %v2901_v1  ;;  %v1568_v17 = vld [vmem:[%s3445_s5] sm:$0xff]  ;;  %p2401_p0 = scmp.ne.s32.totalorder %s2399_s3, %s2400_s4  ;;  %p2406_p4 = scmp.lt.s32.totalorder %s2404_s17, %s2400_s4 }
 0x12c   : > { %1386 = vst [vmem:[%s2922_s9 + $0x18] sm:$0xff] %v1362_v56  ;;  %v1341_v46 = vrot.slane %v1111_v39, 4  ;;  %v1342_v47 = vrot.slane %v1131_v40, 2  ;;  %v1071_v61 = vadd.f32 %v1070_v33, %v2901_v1  ;;  %v1191_v0 = vadd.f32 %v1190_v45, %v2901_v1  ;;  %v1230_v18 = vpop.f32.mrf.mxu0  ;;  %v1575_v33 = vld [vmem:[%s3445_s5 + $0x38] sm:$0xff]  ;;  %v1578_v39 = vld [vmem:[%s3445_s5 + $0x50] sm:$0xff] }
 0x12d   : > { %v1364_v36 = vsel %vm1351_vm3, %v1338_v57, %v1339_v20  ;;  %v1363_v41 = vsel %vm1349_vm2, %v991_v26, %v1337_v24  ;;  %v1340_v62 = vrot.slane %v1091_v60, 6  ;;  %v1211_v2 = vadd.f32 %v1210_v43, %v2901_v1  ;;  %v1571_v26 = vld [vmem:[%s3445_s5 + $0x18] sm:$0xff]  ;;  %v1576_v24 = vld [vmem:[%s3445_s5 + $0x40] sm:$0xff]  ;;  %v1581_v43 = vld [vmem:[%s3445_s5 + $0x68] sm:$0xff]  ;;  %p2402_p1 = pnand %p2401_p0, %p2569_p5  ;;  %p2407_p7 = por %p2406_p4, %p2405_p3 }
 0x12e   : > { %v1365_v44 = vsel %vm588_vm0, %v1363_v41, %v1364_v36  ;;  %v1367_v63 = vsel %vm1351_vm3, %v1341_v46, %v1342_v47  ;;  %v1344_v29 = vrot.slane %v1191_v0, 4  ;;  %v1151_v7 = vadd.f32 %v1150_v28, %v2901_v1  ;;  %v1577_v36 = vld [vmem:[%s3445_s5 + $0x48] sm:$0xff]  ;;  %v1579_v40 = vld [vmem:[%s3445_s5 + $0x58] sm:$0xff]  ;;  %v1580_v41 = vld [vmem:[%s3445_s5 + $0x60] sm:$0xff] }
 0x12f   : > { %1387 = vst [vmem:[%s2922_s9 + $0x20] sm:$0xff] %v1365_v44  ;;  %v1366_v3 = vsel %vm1349_vm2, %v1071_v61, %v1340_v62  ;;  %v1345_v5 = vrot.slane %v1211_v2, 2  ;;  %v1270_v6 = vpop.f32.mrf.mxu2  ;;  %v1291_v14 = vadd.f32 %v1290_v31, %v2901_v1  ;;  %v1231_v49 = vadd.f32 %v1230_v18, %v2901_v1  ;;  %v1582_v44 = vld [vmem:[%s3445_s5 + $0x70] sm:$0xff]  ;;  %v1583_v45 = vld [vmem:[%s3445_s5 + $0x78] sm:$0xff]  ;;  %p2403_p2 = pneg %p2402_p1 }
 0x130   : > { %v1368_v4 = vsel %vm588_vm0, %v1366_v3, %v1367_v63  ;;  %v1170_v38 = vpop.f32.mrf.mxu1  ;;  %v1271_v10 = vadd.f32 %v1270_v6, %v2901_v1  ;;  %v691_v25 = vadd.f32 %v2891_v37, %v2901_v1  ;;  %v671_v34 = vadd.f32 %v2887_v32, %v2901_v1  ;;  %v1598_v6 = vld [vmem:[%s3419_s6 + $0x70] sm:$0xff] }
 0x131   : > { %1388 = vst [vmem:[%s2922_s9 + $0x28] sm:$0xff] %v1368_v4  ;;  %v1171_v8 = vadd.f32 %v1170_v38, %v2901_v1  ;;  %v1370_v12 = vsel %vm1351_vm3, %v1344_v29, %v1345_v5  ;;  %v1348_v22 = vrot.slane %v1291_v14, 2  ;;  %v711_v56 = vadd.f32 %v2889_v35, %v2901_v1  ;;  %v1572_v35 = vld [vmem:[%s3445_s5 + $0x20] sm:$0xff]  ;;  %v1599_v38 = vld [vmem:[%s3419_s6 + $0x78] sm:$0xff]  ;;  %v1594_v18 = vld [vmem:[%s3419_s6 + $0x50] sm:$0xff]  ;;  %p2408_p8 = pnand %p2407_p7, %p2403_p2 }
 0x132   : > { %v1347_v21 = vrot.slane %v1271_v10, 4  ;;  %v1325_v55 = vrot.slane %v691_v25, 6  ;;  %v731_v57 = vadd.f32 %v2893_v42, %v2901_v1  ;;  %v1573_v42 = vld [vmem:[%s3445_s5 + $0x28] sm:$0xff]  ;;  %v1596_v10 = vld [vmem:[%s3419_s6 + $0x60] sm:$0xff] }
 0x133   : > { %v1343_v9 = vrot.slane %v1171_v8, 6  ;;  %v1326_v19 = vrot.slane %v711_v56, 4 }
 0x134   : > { %v1373_v50 = vsel %vm1351_vm3, %v1347_v21, %v1348_v22  ;;  %v1350_v20 = vsel %vm1349_vm2, %v671_v34, %v1325_v55  ;;  %v1327_v37 = vrot.slane %v731_v57, 2  ;;  %v1593_v22 = vld [vmem:[%s3419_s6 + $0x48] sm:$0xff]  ;;  %v1586_v34 = vld [vmem:[%s3419_s6 + $0x10] sm:$0xff]  ;;  %v1584_v57 = vld [vmem:[%s3419_s6] sm:$0xff] }
 0x135   : > { %v1369_v11 = vsel %vm1349_vm2, %v1151_v7, %v1343_v9  ;;  %v1597_v9 = vld [vmem:[%s3419_s6 + $0x68] sm:$0xff] }
 0x136   : > { %v1371_v15 = vsel %vm588_vm0, %v1369_v11, %v1370_v12  ;;  %v1352_v58 = vsel %vm1351_vm3, %v1326_v19, %v1327_v37  ;;  %v1595_v11 = vld [vmem:[%s3419_s6 + $0x58] sm:$0xff]  ;;  %v1714_v37 = vld [vmem:[%s3420_s7] sm:$0xff] }
 0x137   : > { %1389 = vst [vmem:[%s2922_s9 + $0x30] sm:$0xff] %v1371_v15  ;;  %v1353_v32 = vsel %vm588_vm0, %v1350_v20, %v1352_v58  ;;  %v1730_v58 = vld [vmem:[%s3420_s7 + $0x80] sm:$0xff] }
 0x138   : > { %v1250_v48 = vpop.f32.mrf.mxu1  ;;  %1383 = vst [vmem:[%s2922_s9] sm:$0xff] %v1353_v32  ;;  %v1715_v32 = vld [vmem:[%s3420_s7 + $0x8] sm:$0xff] }
 0x139   : > { %v1251_v27 = vadd.f32 %v1250_v48, %v2901_v1  ;;  %v1574_v1 = vld [vmem:[%s3445_s5 + $0x30] sm:$0xff] }
 0x13b   : > { %v1346_v23 = vrot.slane %v1251_v27, 6  ;;  %v1592_v27 = vld [vmem:[%s3419_s6 + $0x40] sm:$0xff] }
 0x13d   : > { %v1372_v51 = vsel %vm1349_vm2, %v1231_v49, %v1346_v23  ;;  %v1591_v23 = vld [vmem:[%s3419_s6 + $0x38] sm:$0xff] }
 0x13e   : > { %v1374_v13 = vsel %vm588_vm0, %v1372_v51, %v1373_v50  ;;  %v1590_v51 = vld [vmem:[%s3419_s6 + $0x30] sm:$0xff] }
 0x13f   : > { %1390 = vst [vmem:[%s2922_s9 + $0x38] sm:$0xff] %v1374_v13 }
 0x18f   : > { %v1565_v52 = vpop.f32.mrf.mxu0 }
 0x190   : > { %v1566_v53 = vadd.f32 %v1565_v52, %v1541_v16  ;;  %v1589_v16 = vld [vmem:[%s3419_s6 + $0x28] sm:$0xff] }
 0x192   : > { %1664 = vmatpush.msra.mxu1 %v1566_v53  ;;  %v1588_v53 = vld [vmem:[%s3419_s6 + $0x20] sm:$0xff] }
 0x193   : > { %2260 = vmatmul.msk.f32.vlgmr.msra.gmra.mxu1 %vm1600_vm4, %v1568_v17 }
 0x19b   : > { %2261 = vmatmul.msk.f32.gmra.mxu1 %vm1600_vm4, %v1569_v54  ;;  %v1587_v54 = vld [vmem:[%s3419_s6 + $0x18] sm:$0xff] }
 0x1a3   : > { %2262 = vmatmul.msk.f32.gmra.mxu1 %vm1600_vm4, %v1570_v30  ;;  %v1585_v30 = vld [vmem:[%s3419_s6 + $0x8] sm:$0xff] }
 0x1ab   : > { %2263 = vmatmul.msk.f32.gmra.mxu1 %vm1600_vm4, %v1571_v26  ;;  %v1731_v26 = vld [vmem:[%s3420_s7 + $0x88] sm:$0xff] }
 0x1b3   : > { %2264 = vmatmul.msk.f32.gmra.mxu1 %vm1600_vm4, %v1572_v35  ;;  %v1716_v35 = vld [vmem:[%s3420_s7 + $0x10] sm:$0xff] }
 0x1bb   : > { %2265 = vmatmul.msk.f32.gmra.mxu1 %vm1600_vm4, %v1573_v42  ;;  %v1732_v42 = vld [vmem:[%s3420_s7 + $0x90] sm:$0xff] }
 0x1c3   : > { %2266 = vmatmul.msk.f32.gmra.mxu1 %vm1600_vm4, %v1574_v1  ;;  %v1717_v1 = vld [vmem:[%s3420_s7 + $0x18] sm:$0xff] }
 0x1cb   : > { %2267 = vmatmul.msk.f32.gmra.mxu1 %vm1600_vm4, %v1575_v33  ;;  %v1733_v33 = vld [vmem:[%s3420_s7 + $0x98] sm:$0xff] }
 0x1d3   : > { %2268 = vmatmul.msk.f32.gmra.mxu1 %vm1600_vm4, %v1576_v24  ;;  %v1718_v24 = vld [vmem:[%s3420_s7 + $0x20] sm:$0xff] }
 0x1db   : > { %2269 = vmatmul.msk.f32.gmra.mxu1 %vm1600_vm4, %v1577_v36  ;;  %v1734_v36 = vld [vmem:[%s3420_s7 + $0xa0] sm:$0xff] }
 0x1e3   : > { %2270 = vmatmul.msk.f32.gmra.mxu1 %vm1600_vm4, %v1578_v39  ;;  %v1719_v39 = vld [vmem:[%s3420_s7 + $0x28] sm:$0xff] }
 0x1eb   : > { %2271 = vmatmul.msk.f32.gmra.mxu1 %vm1600_vm4, %v1579_v40  ;;  %v1735_v40 = vld [vmem:[%s3420_s7 + $0xa8] sm:$0xff] }
 0x1f3   : > { %2272 = vmatmul.msk.f32.gmra.mxu1 %vm1600_vm4, %v1580_v41  ;;  %v1720_v41 = vld [vmem:[%s3420_s7 + $0x30] sm:$0xff] }
 0x1fb   : > { %2273 = vmatmul.msk.f32.gmra.mxu1 %vm1600_vm4, %v1581_v43  ;;  %v1736_v43 = vld [vmem:[%s3420_s7 + $0xb0] sm:$0xff] }
 0x203   : > { %2274 = vmatmul.msk.f32.gmra.mxu1 %vm1600_vm4, %v1582_v44  ;;  %v1721_v44 = vld [vmem:[%s3420_s7 + $0x38] sm:$0xff] }
 0x20b   : > { %2275 = vmatmul.msk.f32.gmra.mxu1 %vm1600_vm4, %v1583_v45  ;;  %v1737_v45 = vld [vmem:[%s3420_s7 + $0xb8] sm:$0xff] }
 0x210   : > { %v3042_v46 = vpop.f32.mrf.mxu1 }
 0x211   : > { %v1667_v19 = vadd.f32 %v3042_v46, %v1584_v57  ;;  %v1722_v46 = vld [vmem:[%s3420_s7 + $0x40] sm:$0xff]  ;;  %v1761_v57 = vld [vmem:[%s3421_s8 + $0x78] sm:$0xff] }
 0x218   : > { %v3044_v47 = vpop.f32.mrf.mxu1 }
 0x219   : > { %v1670_v20 = vadd.f32 %v3044_v47, %v1585_v30  ;;  %v1738_v47 = vld [vmem:[%s3420_s7 + $0xc0] sm:$0xff] }
 0x220   : > { %v3046_v59 = vpop.f32.mrf.mxu1 }
 0x221   : > { %v1673_v56 = vadd.f32 %v3046_v59, %v1586_v34  ;;  %v1723_v59 = vld [vmem:[%s3420_s7 + $0x48] sm:$0xff] }
 0x228   : > { %v1675_v60 = vpop.f32.mrf.mxu1 }
 0x229   : > { %v1676_v55 = vadd.f32 %v1675_v60, %v1587_v54  ;;  %v1739_v60 = vld [vmem:[%s3420_s7 + $0xc8] sm:$0xff] }
 0x230   : > { %v1678_v61 = vpop.f32.mrf.mxu1 }
 0x231   : > { %v1679_v25 = vadd.f32 %v1678_v61, %v1588_v53  ;;  %v1724_v61 = vld [vmem:[%s3420_s7 + $0x50] sm:$0xff] }
 0x238   : > { %v1681_v62 = vpop.f32.mrf.mxu1 }
 0x239   : > { %v1682_v17 = vadd.f32 %v1681_v62, %v1589_v16  ;;  %v1740_v62 = vld [vmem:[%s3420_s7 + $0xd0] sm:$0xff] }
 0x240   : > { %v1684_v63 = vpop.f32.mrf.mxu1 }
 0x241   : > { %v1685_v52 = vadd.f32 %v1684_v63, %v1590_v51  ;;  %v1725_v63 = vld [vmem:[%s3420_s7 + $0x58] sm:$0xff] }
 0x248   : > { %v1687_v0 = vpop.f32.mrf.mxu1 }
 0x249   : > { %v1688_v13 = vadd.f32 %v1687_v0, %v1591_v23  ;;  %v1741_v0 = vld [vmem:[%s3420_s7 + $0xd8] sm:$0xff] }
 0x250   : > { %v1690_v2 = vpop.f32.mrf.mxu1 }
 0x251   : > { %v1691_v50 = vadd.f32 %v1690_v2, %v1592_v27  ;;  %v1726_v2 = vld [vmem:[%s3420_s7 + $0x60] sm:$0xff] }
 0x258   : > { %v1693_v28 = vpop.f32.mrf.mxu1 }
 0x259   : > { %v1694_v49 = vadd.f32 %v1693_v28, %v1593_v22  ;;  %v1742_v28 = vld [vmem:[%s3420_s7 + $0xe0] sm:$0xff] }
 0x260   : > { %v1696_v3 = vpop.f32.mrf.mxu1 }
 0x261   : > { %v1697_v48 = vadd.f32 %v1696_v3, %v1594_v18  ;;  %v1727_v3 = vld [vmem:[%s3420_s7 + $0x68] sm:$0xff] }
 0x268   : > { %v1699_v4 = vpop.f32.mrf.mxu1 }
 0x269   : > { %v1700_v21 = vadd.f32 %v1699_v4, %v1595_v11  ;;  %v1743_v4 = vld [vmem:[%s3420_s7 + $0xe8] sm:$0xff] }
 0x270   : > { %v1702_v29 = vpop.f32.mrf.mxu1 }
 0x271   : > { %v1703_v15 = vadd.f32 %v1702_v29, %v1596_v10  ;;  %v1728_v29 = vld [vmem:[%s3420_s7 + $0x70] sm:$0xff] }
 0x278   : > { %v1705_v5 = vpop.f32.mrf.mxu1 }
 0x279   : > { %v1706_v14 = vadd.f32 %v1705_v5, %v1597_v9  ;;  %v1744_v5 = vld [vmem:[%s3420_s7 + $0xf0] sm:$0xff] }
 0x280   : > { %v1708_v31 = vpop.f32.mrf.mxu1 }
 0x281   : > { %v1709_v12 = vadd.f32 %v1708_v31, %v1598_v6  ;;  %v1729_v31 = vld [vmem:[%s3420_s7 + $0x78] sm:$0xff] }
 0x288   : > { %v1711_v8 = vpop.f32.mrf.mxu1 }
 0x289   : > { %v1712_v7 = vadd.f32 %v1711_v8, %v1599_v38  ;;  %v1745_v38 = vld [vmem:[%s3420_s7 + $0xf8] sm:$0xff] }
 0x28b   : > { %1778 = vmatpush.msra.mxu0 %v1712_v7  ;;  %2284 = vmatpush.msra.mxu2 %v1712_v7 }
 0x28d   : > { %1779 = vmatpush.msra.mxu0 %v1709_v12  ;;  %2285 = vmatpush.msra.mxu2 %v1709_v12 }
 0x28f   : > { %1780 = vmatpush.msra.mxu0 %v1706_v14  ;;  %2286 = vmatpush.msra.mxu2 %v1706_v14 }
 0x291   : > { %1781 = vmatpush.msra.mxu0 %v1703_v15  ;;  %2287 = vmatpush.msra.mxu2 %v1703_v15 }
 0x293   : > { %1782 = vmatpush.msra.mxu0 %v1700_v21  ;;  %2288 = vmatpush.msra.mxu2 %v1700_v21 }
 0x295   : > { %1783 = vmatpush.msra.mxu0 %v1697_v48  ;;  %2289 = vmatpush.msra.mxu2 %v1697_v48 }
 0x297   : > { %1784 = vmatpush.msra.mxu0 %v1694_v49  ;;  %2290 = vmatpush.msra.mxu2 %v1694_v49 }
 0x299   : > { %1785 = vmatpush.msra.mxu0 %v1691_v50  ;;  %2291 = vmatpush.msra.mxu2 %v1691_v50 }
 0x29b   : > { %1786 = vmatpush.msra.mxu0 %v1688_v13  ;;  %2292 = vmatpush.msra.mxu2 %v1688_v13 }
 0x29d   : > { %1787 = vmatpush.msra.mxu0 %v1685_v52  ;;  %2293 = vmatpush.msra.mxu2 %v1685_v52 }
 0x29f   : > { %1788 = vmatpush.msra.mxu0 %v1682_v17  ;;  %2294 = vmatpush.msra.mxu2 %v1682_v17 }
 0x2a1   : > { %1789 = vmatpush.msra.mxu0 %v1679_v25  ;;  %2295 = vmatpush.msra.mxu2 %v1679_v25 }
 0x2a3   : > { %1790 = vmatpush.msra.mxu0 %v1676_v55  ;;  %2296 = vmatpush.msra.mxu2 %v1676_v55 }
 0x2a5   : > { %1791 = vmatpush.msra.mxu0 %v1673_v56  ;;  %2297 = vmatpush.msra.mxu2 %v1673_v56  ;;  %v1760_v56 = vld [vmem:[%s3421_s8 + $0x70] sm:$0xff] }
 0x2a7   : > { %1792 = vmatpush.msra.mxu0 %v1670_v20  ;;  %2298 = vmatpush.msra.mxu2 %v1670_v20  ;;  %v1759_v20 = vld [vmem:[%s3421_s8 + $0x68] sm:$0xff] }
 0x2a9   : > { %1793 = vmatpush.msra.mxu0 %v1667_v19  ;;  %2299 = vmatpush.msra.mxu2 %v1667_v19 }
 0x2aa   : > { %1794 = vmatmul.f32.vlgmr.msra.gmra.mxu0 %v1714_v37  ;;  %1842 = vmatmul.f32.vlgmr.msra.gmra.mxu2 %v1730_v58 }
 0x2b2   : > { %1797 = vmatmul.f32.gmra.mxu0 %v1715_v32  ;;  %1845 = vmatmul.f32.gmra.mxu2 %v1731_v26  ;;  %v1758_v32 = vld [vmem:[%s3421_s8 + $0x60] sm:$0xff] }
 0x2ba   : > { %1800 = vmatmul.f32.gmra.mxu0 %v1716_v35  ;;  %1848 = vmatmul.f32.gmra.mxu2 %v1732_v42  ;;  %v1757_v42 = vld [vmem:[%s3421_s8 + $0x58] sm:$0xff] }
 0x2c2   : > { %1803 = vmatmul.f32.gmra.mxu0 %v1717_v1  ;;  %1851 = vmatmul.f32.gmra.mxu2 %v1733_v33 }
 0x2ca   : > { %1806 = vmatmul.f32.gmra.mxu0 %v1718_v24  ;;  %1854 = vmatmul.f32.gmra.mxu2 %v1734_v36  ;;  %v1756_v24 = vld [vmem:[%s3421_s8 + $0x50] sm:$0xff] }
 0x2d2   : > { %1809 = vmatmul.f32.gmra.mxu0 %v1719_v39  ;;  %1857 = vmatmul.f32.gmra.mxu2 %v1735_v40 }
 0x2da   : > { %1812 = vmatmul.f32.gmra.mxu0 %v1720_v41  ;;  %1860 = vmatmul.f32.gmra.mxu2 %v1736_v43  ;;  %v1755_v41 = vld [vmem:[%s3421_s8 + $0x48] sm:$0xff] }
 0x2e2   : > { %1815 = vmatmul.f32.gmra.mxu0 %v1721_v44  ;;  %1863 = vmatmul.f32.gmra.mxu2 %v1737_v45  ;;  %v1754_v45 = vld [vmem:[%s3421_s8 + $0x40] sm:$0xff] }
 0x2ea   : > { %1818 = vmatmul.f32.gmra.mxu0 %v1722_v46  ;;  %1866 = vmatmul.f32.gmra.mxu2 %v1738_v47 }
 0x2f2   : > { %1821 = vmatmul.f32.gmra.mxu0 %v1723_v59  ;;  %1869 = vmatmul.f32.gmra.mxu2 %v1739_v60  ;;  %v1753_v59 = vld [vmem:[%s3421_s8 + $0x38] sm:$0xff] }
 0x2fa   : > { %1824 = vmatmul.f32.gmra.mxu0 %v1724_v61  ;;  %1872 = vmatmul.f32.gmra.mxu2 %v1740_v62  ;;  %v1752_v62 = vld [vmem:[%s3421_s8 + $0x30] sm:$0xff] }
 0x302   : > { %1827 = vmatmul.f32.gmra.mxu0 %v1725_v63  ;;  %1875 = vmatmul.f32.gmra.mxu2 %v1741_v0 }
 0x30a   : > { %1830 = vmatmul.f32.gmra.mxu0 %v1726_v2  ;;  %1878 = vmatmul.f32.gmra.mxu2 %v1742_v28  ;;  %v1751_v2 = vld [vmem:[%s3421_s8 + $0x28] sm:$0xff] }
 0x312   : > { %1833 = vmatmul.f32.gmra.mxu0 %v1727_v3  ;;  %1881 = vmatmul.f32.gmra.mxu2 %v1743_v4 }
 0x31a   : > { %1836 = vmatmul.f32.gmra.mxu0 %v1728_v29  ;;  %1884 = vmatmul.f32.gmra.mxu2 %v1744_v5  ;;  %v1750_v29 = vld [vmem:[%s3421_s8 + $0x20] sm:$0xff] }
 0x322   : > { %1839 = vmatmul.f32.gmra.mxu0 %v1729_v31  ;;  %1887 = vmatmul.f32.gmra.mxu2 %v1745_v38  ;;  %v1749_v38 = vld [vmem:[%s3421_s8 + $0x18] sm:$0xff] }
 0x327   : > { %v3195_v6 = vpop.f32.mrf.mxu0 }
 0x32d   : > { %v3197_v8 = vpop.f32.mrf.mxu2 }
 0x32f   : > { %v3199_v7 = vpop.f32.mrf.mxu0 }
 0x335   : > { %v3201_v9 = vpop.f32.mrf.mxu2 }
 0x337   : > { %v3203_v12 = vpop.f32.mrf.mxu0 }
 0x33d   : > { %v3205_v10 = vpop.f32.mrf.mxu2 }
 0x33f   : > { %v3207_v14 = vpop.f32.mrf.mxu0 }
 0x345   : > { %v3209_v11 = vpop.f32.mrf.mxu2 }
 0x347   : > { %v3211_v15 = vpop.f32.mrf.mxu0 }
 0x34d   : > { %v3213_v18 = vpop.f32.mrf.mxu2 }
 0x34f   : > { %v1810_v21 = vpop.f32.mrf.mxu0 }
 0x350   : > { %v1811_v5 = vadd.f32 %v1810_v21, %v1751_v2  ;;  %v1747_v21 = vld [vmem:[%s3421_s8 + $0x8] sm:$0xff] }
 0x351   : > { %v1927_v2 = vld [vmem:[#allocation2 + $0x20] sm:$0xff] }
 0x355   : > { %v3215_v22 = vpop.f32.mrf.mxu2 }
 0x357   : > { %v1813_v48 = vpop.f32.mrf.mxu0 }
 0x358   : > { %v1814_v3 = vadd.f32 %v1813_v48, %v1752_v62  ;;  %v1748_v48 = vld [vmem:[%s3421_s8 + $0x10] sm:$0xff] }
 0x35d   : > { %v3217_v49 = vpop.f32.mrf.mxu2 }
 0x35f   : > { %v1816_v27 = vpop.f32.mrf.mxu0 }
 0x360   : > { %v1817_v63 = vadd.f32 %v1816_v27, %v1753_v59  ;;  %v1808_v27 = vadd.f32 %v3211_v15, %v1750_v29  ;;  %v1746_v15 = vld [vmem:[%s3421_s8] sm:$0xff] }
 0x362   : > { %v1898_v31 = vmax.f32 %v1817_v63, 0.0 }
 0x365   : > { %v3219_v50 = vpop.f32.mrf.mxu2 }
 0x367   : > { %v1819_v23 = vpop.f32.mrf.mxu0 }
 0x368   : > { %v1820_v60 = vadd.f32 %v1819_v23, %v1754_v45  ;;  %v1897_v23 = vmax.f32 %v1814_v3, 0.0  ;;  %v1770_v45 = vld [vmem:[%s3421_s8 + $0xc0] sm:$0xff] }
 0x36a   : > { %v1899_v4 = vmax.f32 %v1820_v60, 0.0 }
 0x36d   : > { %v3221_v13 = vpop.f32.mrf.mxu2 }
 0x36e   : > { %v1868_v59 = vadd.f32 %v3221_v13, %v1770_v45  ;;  %v1766_v13 = vld [vmem:[%s3421_s8 + $0xa0] sm:$0xff]  ;;  %v1946_v45 = vld [vmem:[%s3423_s10 + $0x38] sm:$0xff] }
 0x36f   : > { %v1822_v51 = vpop.f32.mrf.mxu0 }
 0x370   : > { %v1823_v46 = vadd.f32 %v1822_v51, %v1755_v41  ;;  %v1805_v51 = vadd.f32 %v3207_v14, %v1749_v38  ;;  %v1799_v14 = vadd.f32 %v3199_v7, %v1747_v21  ;;  %v1774_v7 = vld [vmem:[%s3421_s8 + $0xe0] sm:$0xff] }
 0x372   : > { %v1900_v0 = vmax.f32 %v1823_v46, 0.0 }
 0x375   : > { %v3223_v52 = vpop.f32.mrf.mxu2 }
 0x377   : > { %v1825_v16 = vpop.f32.mrf.mxu0 }
 0x378   : > { %v1826_v43 = vadd.f32 %v1825_v16, %v1756_v24  ;;  %v1896_v16 = vmax.f32 %v1811_v5, 0.0  ;;  %v1773_v24 = vld [vmem:[%s3421_s8 + $0xd8] sm:$0xff] }
 0x37a   : > { %v1901_v61 = vmax.f32 %v1826_v43, 0.0 }
 0x37d   : > { %v3225_v54 = vpop.f32.mrf.mxu2 }
 0x37f   : > { %v1828_v53 = vpop.f32.mrf.mxu0 }
 0x380   : > { %v1829_v39 = vadd.f32 %v1828_v53, %v1757_v42  ;;  %v1802_v53 = vadd.f32 %v3203_v12, %v1748_v48  ;;  %v1796_v12 = vadd.f32 %v3195_v6, %v1746_v15  ;;  %v1935_v15 = vld [vmem:[#allocation2 + $0x60] sm:$0xff] }
 0x382   : > { %v1902_v47 = vmax.f32 %v1829_v39, 0.0 }
 0x385   : > { %v3227_v34 = vpop.f32.mrf.mxu2 }
 0x387   : > { %v1831_v17 = vpop.f32.mrf.mxu0 }
 0x388   : > { %v1832_v1 = vadd.f32 %v1831_v17, %v1758_v32  ;;  %v1895_v17 = vmax.f32 %v1808_v27, 0.0 }
 0x38a   : > { %v1903_v44 = vmax.f32 %v1832_v1, 0.0  ;;  %v1923_v1 = vld [vmem:[#allocation2] sm:$0xff] }
 0x38d   : > { %v3229_v30 = vpop.f32.mrf.mxu2 }
 0x38e   : > { %v1880_v6 = vadd.f32 %v3229_v30, %v1774_v7  ;;  %v1771_v30 = vld [vmem:[%s3421_s8 + $0xc8] sm:$0xff] }
 0x38f   : > { %v1834_v25 = vpop.f32.mrf.mxu0  ;;  %v1871_v46 = vadd.f32 %v3223_v52, %v1771_v30  ;;  %v1767_v52 = vld [vmem:[%s3421_s8 + $0xa8] sm:$0xff] }
 0x390   : > { %v1835_v26 = vadd.f32 %v1834_v25, %v1759_v20  ;;  %v1777_v25 = vld [vmem:[%s3421_s8 + $0xf8] sm:$0xff]  ;;  %v1893_v20 = vmax.f32 %v1802_v53, 0.0  ;;  %v1919_v41 = vmax.f32 %v1880_v6, 0.0 }
 0x391   : > { %v1916_v62 = vmax.f32 %v1871_v46, 0.0  ;;  %v1944_v46 = vld [vmem:[%s3423_s10 + $0x28] sm:$0xff] }
 0x392   : > { %v1904_v40 = vmax.f32 %v1835_v26, 0.0  ;;  %v1891_v26 = vmax.f32 %v1796_v12, 0.0  ;;  %v1936_v12 = vld [vmem:[#allocation2 + $0x68] sm:$0xff] }
 0x395   : > { %v1882_v36 = vpop.f32.mrf.mxu2 }
 0x397   : > { %v1837_v55 = vpop.f32.mrf.mxu0 }
 0x398   : > { %v1838_v37 = vadd.f32 %v1837_v55, %v1760_v56  ;;  %v1894_v56 = vmax.f32 %v1805_v51, 0.0 }
 0x39a   : > { %v1905_v33 = vmax.f32 %v1838_v37, 0.0  ;;  %v1775_v37 = vld [vmem:[%s3421_s8 + $0xe8] sm:$0xff] }
 0x39d   : > { %v1885_v28 = vpop.f32.mrf.mxu2 }
 0x39f   : > { %v1840_v19 = vpop.f32.mrf.mxu0 }
 0x3a0   : > { %v1841_v58 = vadd.f32 %v1840_v19, %v1761_v57  ;;  %v1776_v57 = vld [vmem:[%s3421_s8 + $0xf0] sm:$0xff] }
 0x3a1   : > { %v1886_v32 = vadd.f32 %v1885_v28, %v1776_v57  ;;  %v1859_v28 = vadd.f32 %v3215_v22, %v1767_v52  ;;  %v1763_v22 = vld [vmem:[%s3421_s8 + $0x88] sm:$0xff]  ;;  %v1934_v57 = vld [vmem:[#allocation2 + $0x58] sm:$0xff]  ;;  %v1942_v52 = vld [vmem:[%s3423_s10 + $0x18] sm:$0xff] }
 0x3a2   : > { %v1906_v35 = vmax.f32 %v1841_v58, 0.0  ;;  %v1892_v58 = vmax.f32 %v1799_v14, 0.0  ;;  %v1847_v48 = vadd.f32 %v3201_v9, %v1763_v22  ;;  %v1924_v9 = vld [vmem:[#allocation2 + $0x8] sm:$0xff]  ;;  %v1930_v14 = vld [vmem:[#allocation2 + $0x38] sm:$0xff] }
 0x3a4   : > { %1947 = vmatpush.msrb.mxu3 %v1906_v35  ;;  %v1883_v35 = vadd.f32 %v1882_v36, %v1775_v37  ;;  %v1877_v36 = vadd.f32 %v3227_v34, %v1773_v24  ;;  %v1769_v34 = vld [vmem:[%s3421_s8 + $0xb8] sm:$0xff]  ;;  %v1908_v21 = vmax.f32 %v1847_v48, 0.0 }
 0x3a5   : > { %v1888_v55 = vpop.f32.mrf.mxu2 }
 0x3a6   : > { %1948 = vmatpush.msrb.mxu3 %v1905_v33  ;;  %v1889_v19 = vadd.f32 %v1888_v55, %v1777_v25  ;;  %v1921_v33 = vmax.f32 %v1886_v32, 0.0  ;;  %v1920_v39 = vmax.f32 %v1883_v35, 0.0  ;;  %v1937_v25 = vld [vmem:[#allocation2 + $0x70] sm:$0xff]  ;;  %v1926_v55 = vld [vmem:[#allocation2 + $0x18] sm:$0xff] }
 0x3a8   : > { %1949 = vmatpush.msrb.mxu3 %v1904_v40  ;;  %v1922_v42 = vmax.f32 %v1889_v19, 0.0  ;;  %v1772_v40 = vld [vmem:[%s3421_s8 + $0xd0] sm:$0xff] }
 0x3a9   : > { %v1874_v43 = vadd.f32 %v3225_v54, %v1772_v40  ;;  %v1768_v54 = vld [vmem:[%s3421_s8 + $0xb0] sm:$0xff] }
 0x3aa   : > { %1950 = vmatpush.msrb.mxu3 %v1903_v44  ;;  %v1925_v44 = vld [vmem:[#allocation2 + $0x10] sm:$0xff]  ;;  %v1862_v63 = vadd.f32 %v3217_v49, %v1768_v54  ;;  %v1764_v49 = vld [vmem:[%s3421_s8 + $0x90] sm:$0xff] }
 0x3ab   : > { %v1917_v60 = vmax.f32 %v1874_v43, 0.0  ;;  %v1850_v38 = vadd.f32 %v3205_v10, %v1764_v49  ;;  %v1931_v10 = vld [vmem:[#allocation2 + $0x40] sm:$0xff] }
 0x3ac   : > { %1951 = vmatpush.msrb.mxu3 %v1902_v47  ;;  %v1918_v47 = vmax.f32 %v1877_v36, 0.0  ;;  %v1913_v29 = vmax.f32 %v1862_v63, 0.0 }
 0x3ae   : > { %1952 = vmatpush.msrb.mxu3 %v1901_v61  ;;  %v1865_v61 = vadd.f32 %v3219_v50, %v1769_v34  ;;  %v1765_v50 = vld [vmem:[%s3421_s8 + $0x98] sm:$0xff] }
 0x3af   : > { %v1853_v5 = vadd.f32 %v3209_v11, %v1765_v50 }
 0x3b0   : > { %1953 = vmatpush.msrb.mxu3 %v1900_v0  ;;  %v1915_v0 = vmax.f32 %v1868_v59, 0.0  ;;  %v1914_v3 = vmax.f32 %v1865_v61, 0.0  ;;  %v1943_v59 = vld [vmem:[%s3423_s10 + $0x20] sm:$0xff] }
 0x3b1   : > { %v1910_v51 = vmax.f32 %v1853_v5, 0.0 }
 0x3b2   : > { %1954 = vmatpush.msrb.mxu3 %v1899_v4  ;;  %v1856_v4 = vadd.f32 %v3213_v18, %v1766_v13  ;;  %v1762_v18 = vld [vmem:[%s3421_s8 + $0x80] sm:$0xff]  ;;  %v1941_v13 = vld [vmem:[%s3423_s10 + $0x10] sm:$0xff] }
 0x3b3   : > { %v1844_v11 = vadd.f32 %v3197_v8, %v1762_v18  ;;  %v1928_v8 = vld [vmem:[#allocation2 + $0x28] sm:$0xff] }
 0x3b4   : > { %1955 = vmatpush.msrb.mxu3 %v1898_v31  ;;  %v1912_v31 = vmax.f32 %v1859_v28, 0.0  ;;  %v1911_v27 = vmax.f32 %v1856_v4, 0.0  ;;  %v1940_v4 = vld [vmem:[%s3423_s10 + $0x8] sm:$0xff] }
 0x3b5   : > { %v1907_v53 = vmax.f32 %v1844_v11, 0.0  ;;  %v2037_v11 = vld [vmem:[%s3424_s11] sm:$0x3] }
 0x3b6   : > { %1956 = vmatpush.msrb.mxu3 %v1897_v23  ;;  %v1929_v23 = vld [vmem:[#allocation2 + $0x30] sm:$0xff] }
 0x3b8   : > { %1957 = vmatpush.msrb.mxu3 %v1896_v16  ;;  %v1909_v16 = vmax.f32 %v1850_v38, 0.0 }
 0x3ba   : > { %1958 = vmatpush.msrb.mxu3 %v1895_v17  ;;  %v1933_v17 = vld [vmem:[#allocation2 + $0x50] sm:$0xff] }
 0x3bc   : > { %1959 = vmatpush.msrb.mxu3 %v1894_v56  ;;  %v1932_v56 = vld [vmem:[#allocation2 + $0x48] sm:$0xff] }
 0x3be   : > { %1960 = vmatpush.msrb.mxu3 %v1893_v20  ;;  %v1938_v20 = vld [vmem:[#allocation2 + $0x78] sm:$0xff] }
 0x3c0   : > { %1961 = vmatpush.msrb.mxu3 %v1892_v58 }
 0x3c2   : > { %1962 = vmatpush.msrb.mxu3 %v1891_v26 }
 0x3c3   : > { %1963 = vmatmul.f32.vlgmr.msrb.gmra.mxu3 %v1923_v1  ;;  %v1939_v1 = vld [vmem:[%s3423_s10] sm:$0xff] }
 0x3c4   : > { %1988 = vmatpush.msra.mxu3 %v1922_v42 }
 0x3c6   : > { %1989 = vmatpush.msra.mxu3 %v1921_v33 }
 0x3c8   : > { %1990 = vmatpush.msra.mxu3 %v1920_v39 }
 0x3ca   : > { %1991 = vmatpush.msra.mxu3 %v1919_v41 }
 0x3cb   : > { %1966 = vmatmul.f32.gmra.mxu3 %v1925_v44  ;;  %v1945_v44 = vld [vmem:[%s3423_s10 + $0x30] sm:$0xff] }
 0x3cc   : > { %1992 = vmatpush.msra.mxu3 %v1918_v47 }
 0x3ce   : > { %1993 = vmatpush.msra.mxu3 %v1917_v60 }
 0x3d0   : > { %1994 = vmatpush.msra.mxu3 %v1916_v62 }
 0x3d2   : > { %1995 = vmatpush.msra.mxu3 %v1915_v0 }
 0x3d3   : > { %1969 = vmatmul.f32.gmra.mxu3 %v1927_v2 }
 0x3d4   : > { %1996 = vmatpush.msra.mxu3 %v1914_v3 }
 0x3d6   : > { %1997 = vmatpush.msra.mxu3 %v1913_v29 }
 0x3d8   : > { %1998 = vmatpush.msra.mxu3 %v1912_v31 }
 0x3da   : > { %1999 = vmatpush.msra.mxu3 %v1911_v27 }
 0x3db   : > { %1972 = vmatmul.f32.gmra.mxu3 %v1929_v23 }
 0x3dc   : > { %2000 = vmatpush.msra.mxu3 %v1910_v51 }
 0x3de   : > { %2001 = vmatpush.msra.mxu3 %v1909_v16 }
 0x3e0   : > { %2002 = vmatpush.msra.mxu3 %v1908_v21 }
 0x3e2   : > { %2003 = vmatpush.msra.mxu3 %v1907_v53 }
 0x3e3   : > { %1975 = vmatmul.f32.gmra.mxu3 %v1931_v10 }
 0x3eb   : > { %1978 = vmatmul.f32.gmra.mxu3 %v1933_v17 }
 0x3f3   : > { %1981 = vmatmul.f32.gmra.mxu3 %v1935_v15 }
 0x3fb   : > { %1984 = vmatmul.f32.gmra.mxu3 %v1937_v25 }
 0x403   : > { %2004 = vmatmul.f32.vlgmr.msra.gmra.mxu3 %v1924_v9 }
 0x40b   : > { %2007 = vmatmul.f32.gmra.mxu3 %v1926_v55 }
 0x413   : > { %2010 = vmatmul.f32.gmra.mxu3 %v1928_v8 }
 0x41b   : > { %2013 = vmatmul.f32.gmra.mxu3 %v1930_v14 }
 0x423   : > { %2016 = vmatmul.f32.gmra.mxu3 %v1932_v56 }
 0x42b   : > { %2019 = vmatmul.f32.gmra.mxu3 %v1934_v57 }
 0x433   : > { %2022 = vmatmul.f32.gmra.mxu3 %v1936_v12 }
 0x43b   : > { %2025 = vmatmul.f32.gmra.mxu3 %v1938_v20 }
 0x446   : > { %v1964_v19 = vpop.f32.mrf.mxu3 }
 0x447   : > { %v1965_v6 = vadd.f32 %v1964_v19, %v1939_v1 }
 0x44e   : > { %v1967_v37 = vpop.f32.mrf.mxu3 }
 0x44f   : > { %v1968_v31 = vadd.f32 %v1967_v37, %v1940_v4 }
 0x456   : > { %v1970_v58 = vpop.f32.mrf.mxu3 }
 0x457   : > { %v1971_v29 = vadd.f32 %v1970_v58, %v1941_v13 }
 0x45e   : > { %v1973_v32 = vpop.f32.mrf.mxu3 }
 0x45f   : > { %v1974_v28 = vadd.f32 %v1973_v32, %v1942_v52 }
 0x466   : > { %v1976_v7 = vpop.f32.mrf.mxu3 }
 0x467   : > { %v1977_v63 = vadd.f32 %v1976_v7, %v1943_v59 }
 0x46e   : > { %v1979_v26 = vpop.f32.mrf.mxu3 }
 0x46f   : > { %v1980_v54 = vadd.f32 %v1979_v26, %v1944_v46 }
 0x476   : > { %v1982_v35 = vpop.f32.mrf.mxu3 }
 0x477   : > { %v1983_v47 = vadd.f32 %v1982_v35, %v1945_v44 }
 0x47e   : > { %v1985_v42 = vpop.f32.mrf.mxu3 }
 0x47f   : > { %v1986_v34 = vadd.f32 %v1985_v42, %v1946_v45 }
 0x486   : > { %v2005_v33 = vpop.f32.mrf.mxu3 }
 0x487   : > { %v2006_v24 = vadd.f32 %v2005_v33, %v1965_v6 }
 0x489   : > { %v2029_v51 = vmax.f32 %v2006_v24, 0.0 }
 0x48e   : > { %v2008_v39 = vpop.f32.mrf.mxu3 }
 0x48f   : > { %v2009_v27 = vadd.f32 %v2008_v39, %v1968_v31 }
 0x491   : > { %v2030_v48 = vmax.f32 %v2009_v27, 0.0 }
 0x496   : > { %v2011_v40 = vpop.f32.mrf.mxu3 }
 0x497   : > { %v2012_v22 = vadd.f32 %v2011_v40, %v1971_v29 }
 0x499   : > { %v2031_v18 = vmax.f32 %v2012_v22, 0.0 }
 0x49e   : > { %v2014_v36 = vpop.f32.mrf.mxu3 }
 0x49f   : > { %v2015_v49 = vadd.f32 %v2014_v36, %v1974_v28 }
 0x4a1   : > { %v2032_v23 = vmax.f32 %v2015_v49, 0.0 }
 0x4a6   : > { %v2017_v41 = vpop.f32.mrf.mxu3 }
 0x4a7   : > { %v2018_v3 = vadd.f32 %v2017_v41, %v1977_v63 }
 0x4a9   : > { %v2033_v38 = vmax.f32 %v2018_v3, 0.0 }
 0x4ae   : > { %v2020_v30 = vpop.f32.mrf.mxu3 }
 0x4af   : > { %v2021_v0 = vadd.f32 %v2020_v30, %v1980_v54 }
 0x4b1   : > { %v2034_v5 = vmax.f32 %v2021_v0, 0.0 }
 0x4b6   : > { %v2023_v43 = vpop.f32.mrf.mxu3 }
 0x4b7   : > { %v2024_v61 = vadd.f32 %v2023_v43, %v1983_v47 }
 0x4b9   : > { %v2035_v50 = vmax.f32 %v2024_v61, 0.0 }
 0x4be   : > { %v2026_v60 = vpop.f32.mrf.mxu3 }
 0x4bf   : > { %v2027_v62 = vadd.f32 %v2026_v60, %v1986_v34 }
 0x4c1   : > { %v2036_v2 = vmax.f32 %v2027_v62, 0.0 }
 0x4c3   : > { %2051 = vmatpush.msrb.mxu3 %v2036_v2 }
 0x4c5   : > { %2052 = vmatpush.msrb.mxu3 %v2035_v50 }
 0x4c7   : > { %2053 = vmatpush.msrb.mxu3 %v2034_v5 }
 0x4c9   : > { %2054 = vmatpush.msrb.mxu3 %v2033_v38 }
 0x4cb   : > { %2055 = vmatpush.msrb.mxu3 %v2032_v23 }
 0x4cd   : > { %2056 = vmatpush.msrb.mxu3 %v2031_v18 }
 0x4cf   : > { %2057 = vmatpush.msrb.mxu3 %v2030_v48 }
 0x4d1   : > { %2058 = vmatpush.msrb.mxu3 %v2029_v51 }
 0x4d2   : > { %2276 = vmatmul.msk.f32.vlgmr.msrb.gmra.mxu3 %vm2039_vm5, %v2037_v11 }
 0x4d3   : > { %2411 = shalt.err (!%p2408_p8)
}
 0x4d4   : > { %2304 = dma.vmem_to_hbm [thread:$0]  (%p2569_p5), %s2084_s22, 1024, %s2086_s27, %s2066_s2   ;;  %v2038_v16 = vld [vmem:[%s3425_s12] sm:$0x3]  ;;  %vm2063_vm6 = vcmask 1024  }
 0x4d5   : > { %s2193_s9 = sshll.u32 %s2591_s25, 1 }
 0x4d6   : > { %s493_s0 = scalar_lea.vmem %s3427_s14, %s2193_s9 }
 0x555   : > { %v2060_v21 = vpop.f32.mrf.mxu3 }
 0x556   : > { %v2061_v53 = vadd.f32 %v2060_v21, %v2038_v16 }
 0x558   : > { %2064 = vst.msk [vmem:[%s493_s0] sm:$0x3] %vm2063_vm6, %v2061_v53 }
 0x559 PF: > { %p2316_p9 = scmp.ge.s32.totalorder %s2450_s16, 2  ;;  %s2100_s3 = sand.u32 1, %s2438_s29  }
 0x55a   : > { %s2101_s4 = scalar_lea.sflag [#allocation4], %s2100_s3 }
 0x55b   : > { %p2311_p5 = pnand %p2316_p9, %p2573_p6 }
 0x55d   : > { %p2312_p10 = pneg %p2311_p5 }
 0x55f   : > { %2433 = dma.done.wait (%p2312_p10), %s2101_s4, 1024  }
 0x560   : > { %2435 = vsyncadd (%p2312_p10), %s2101_s4, 4294966272  ;;  %s3447_s5 = sld [smem:[#allocation8_spill]]  ;;  %p26_p11 = scmp.ge.s32.totalorder %s2556_s19, 4  }
 0x561   : > { %s3448_s29 = smov %s2442_s30  ;;  %s3449_s30 = smov %s2446_s15 }
 0x562   : > { %s3451_s16 = smov %s2556_s19  ;;  %28 = sbr.rel (!%p26_p11) target bundleno = 12 (0xc), region = 130 }
 0x566   : > { %s3450_s15 = smov %s3447_s5 }
 0x567   :  { %2114 = vsyncpa [#allocation3], 1 }
 0x568   :  { %2116 = vsyncpa [#allocation3 + $0x1], 1 }
 0x569   :  { %2117 = vsyncpa [#allocation4], 1 }
 0x56a   :  { %2119 = vsyncpa [#allocation4 + $0x1], 1 }

</bundles_post_ra>
